<compile_context>
chip_gen: v7x
topology: tpu7x:2x2x1
jax: 0.10.0
libtpu: 0.0.40
codegen_flags: <defaults>
</compile_context>

<pallas_src>
import functools

import jax
import jax.numpy as jnp
from jax.experimental import pallas as pl
from jax.experimental.pallas import tpu as pltpu


def lstm_encoder_kernel(ids_ref, fused_w_ref, bias_ref,
                        whh_hbm, wfc_hbm, bfc_hbm,
                        out_ref,
                        gx_ref, whh_vmem, wfc_vmem, bfc_vmem, dma_sems,
                        *, seq_len, batch, hidden, vocab):
    T, B, H, V = seq_len, batch, hidden, vocab

    # ---- Kick off weight DMAs so they overlap the prologue matmul. ----
    whh_cp = pltpu.make_async_copy(whh_hbm, whh_vmem, dma_sems.at[0])
    wfc_cp = pltpu.make_async_copy(wfc_hbm, wfc_vmem, dma_sems.at[1])
    bfc_cp = pltpu.make_async_copy(bfc_hbm, bfc_vmem, dma_sems.at[2])
    whh_cp.start()
    wfc_cp.start()
    bfc_cp.start()

    # ---- Fused embedding-gather + input projection (time-major rows). ----
    # onehot @ (emb_w @ W_ih) + bias  ==  gather(emb_w) @ W_ih + bias
    ids = ids_ref[...]                                              # (T*B, 1) int32
    col = jax.lax.broadcasted_iota(jnp.int32, (T * B, V), 1)        # (T*B, V)
    onehot = (ids == col).astype(jnp.float32)                       # (T*B, V)
    gx_ref[...] = (jnp.dot(onehot, fused_w_ref[...],
                           preferred_element_type=jnp.float32)
                   + bias_ref[...])                                 # (T*B, 4H)

    # W_hh is needed only now -> its DMA was hidden behind the matmul above.
    whh_cp.wait()

    # ---- Serial recurrence. Gate column order is [i, f, o, g]. ----
    def step(t, carry):
        h, c = carry
        base = pl.multiple_of(t * B, B)
        gates = gx_ref[pl.ds(base, B), :] + jnp.dot(
            h, whh_vmem[...], preferred_element_type=jnp.float32)   # (B, 4H)
        sig = jax.nn.sigmoid(gates[:, 0:3 * H])                     # one EUP pass
        i_g = sig[:, 0 * H:1 * H]
        f_g = sig[:, 1 * H:2 * H]
        o_g = sig[:, 2 * H:3 * H]
        g_g = jnp.tanh(gates[:, 3 * H:4 * H])
        c_new = f_g * c + i_g * g_g
        h_new = o_g * jnp.tanh(c_new)
        return (h_new, c_new)

    h0 = jnp.zeros((B, H), jnp.float32)
    c0 = jnp.zeros((B, H), jnp.float32)
    h, _ = jax.lax.fori_loop(0, T, step, (h0, c0), unroll=True)

    # FC weights only needed now -> their DMAs were hidden behind the loop.
    wfc_cp.wait()
    bfc_cp.wait()

    # ---- Final FC on the last hidden state. ----
    out_ref[...] = (jnp.dot(h, wfc_vmem[...],
                            preferred_element_type=jnp.float32)
                    + bfc_vmem[...]).astype(out_ref.dtype)


def lstm_encoder_pallas(input_seq, params):
    """input_seq: (B, T) int32 token ids."""
    emb_w = params["embedding"]          # (V, E), row 0 zeros (padding_idx=0)
    w_ih = params["w_ih"]                # (E, 4H)
    w_hh = params["w_hh"]                # (H, 4H)
    bias = params["bias"]                # (1, 4H)  == b_ih + b_hh
    w_fc = params["w_fc"]                # (H, O)
    b_fc = params["b_fc"]                # (1, O)

    B, T = input_seq.shape
    V, E = emb_w.shape
    H = w_hh.shape[0]
    O = w_fc.shape[1]

    # One-time param prep (outside the kernel):
    #  * fuse embedding and input projection:  fused_w = emb_w @ w_ih   (V, 4H)
    #  * permute gate columns [i, f, g, o] -> [i, f, o, g]
    perm = jnp.concatenate([jnp.arange(0, 2 * H),          # i, f
                            jnp.arange(3 * H, 4 * H),      # o
                            jnp.arange(2 * H, 3 * H)])     # g
    fused_w = (emb_w @ w_ih)[:, perm]                      # (V, 4H); row 0 stays 0
    w_hh_p = w_hh[:, perm]
    bias_p = bias[:, perm]

    # Tiny glue: time-major flatten of the token ids (256 bytes).
    ids_tb = jnp.transpose(input_seq).reshape(T * B, 1).astype(jnp.int32)

    kernel = functools.partial(lstm_encoder_kernel,
                               seq_len=T, batch=B, hidden=H, vocab=V)

    vmem = pltpu.MemorySpace.VMEM
    return pl.pallas_call(
        kernel,
        out_shape=jax.ShapeDtypeStruct((B, O), jnp.float32),
        in_specs=[pl.BlockSpec(memory_space=vmem),       # ids (tiny)
                  pl.BlockSpec(memory_space=vmem),       # fused_w (needed first)
                  pl.BlockSpec(memory_space=vmem),       # bias
                  pl.BlockSpec(memory_space=pl.ANY),     # w_hh  -> manual DMA
                  pl.BlockSpec(memory_space=pl.ANY),     # w_fc  -> manual DMA
                  pl.BlockSpec(memory_space=pl.ANY)],    # b_fc  -> manual DMA
        out_specs=pl.BlockSpec(memory_space=vmem),
        scratch_shapes=[
            pltpu.VMEM((T * B, 4 * H), jnp.float32),     # gates_x
            pltpu.VMEM((H, 4 * H), jnp.float32),         # W_hh landing buffer
            pltpu.VMEM((H, O), jnp.float32),             # W_fc landing buffer
            pltpu.VMEM((1, O), jnp.float32),             # b_fc landing buffer
            pltpu.SemaphoreType.DMA((3,)),
        ],
    )(ids_tb, fused_w, bias_p, w_hh_p, w_fc, b_fc)


def lstm_encoder_reference(input_seq, params):
    """Pure-JAX reference mirroring torch nn.Embedding + nn.LSTM + nn.Linear."""
    emb_w = params["embedding"]
    w_ih, w_hh = params["w_ih"], params["w_hh"]
    bias, w_fc, b_fc = params["bias"], params["w_fc"], params["b_fc"]
    H = w_hh.shape[0]

    x = jnp.take(emb_w, input_seq, axis=0)          # (B, T, E)
    B = x.shape[0]

    def step(carry, x_t):
        h, c = carry
        gates = x_t @ w_ih + h @ w_hh + bias
        i = jax.nn.sigmoid(gates[:, 0 * H:1 * H])
        f = jax.nn.sigmoid(gates[:, 1 * H:2 * H])
        g = jnp.tanh(gates[:, 2 * H:3 * H])
        o = jax.nn.sigmoid(gates[:, 3 * H:4 * H])
        c = f * c + i * g
        h = o * jnp.tanh(c)
        return (h, c), h

    h0 = jnp.zeros((B, H), jnp.float32)
    c0 = jnp.zeros((B, H), jnp.float32)
    (h_last, _), _ = jax.lax.scan(step, (h0, c0), jnp.transpose(x, (1, 0, 2)))
    return h_last @ w_fc + b_fc


def init_params(key, vocab=320, embed=128, hidden=128, output=128):
    ks = jax.random.split(key, 7)
    scale = 0.05
    emb = scale * jax.random.normal(ks[0], (vocab, embed), jnp.float32)
    emb = emb.at[0].set(0.0)                         # padding_idx=0 -> zero row
    # Torch stores W_ih as (4H, E); we keep the transposed (E, 4H) layout.
    w_ih = scale * jax.random.normal(ks[1], (embed, 4 * hidden), jnp.float32)
    w_hh = scale * jax.random.normal(ks[2], (hidden, 4 * hidden), jnp.float32)
    b_ih = scale * jax.random.normal(ks[3], (4 * hidden,), jnp.float32)
    b_hh = scale * jax.random.normal(ks[4], (4 * hidden,), jnp.float32)
    w_fc = scale * jax.random.normal(ks[5], (hidden, output), jnp.float32)
    b_fc = scale * jax.random.normal(ks[6], (output,), jnp.float32)
    return {
        "embedding": emb,
        "w_ih": w_ih,
        "w_hh": w_hh,
        "bias": (b_ih + b_hh)[None, :],
        "w_fc": w_fc,
        "b_fc": b_fc[None, :],
    }


if __name__ == "__main__":
    key = jax.random.PRNGKey(0)
    k_par, k_seq = jax.random.split(key)

    B, T = 8, 8
    params = init_params(k_par, vocab=320, embed=128, hidden=128, output=128)

    # Token ids in [0, 320); force a few padding (0) tokens.
    # NOTE: the one-hot gather maps out-of-range ids to a zero embedding row;
    # valid ids in [0, V) are required (torch would raise on OOB anyway).
    input_seq = jax.random.randint(k_seq, (B, T), 0, 320, dtype=jnp.int32)
    input_seq = input_seq.at[:, 0].set(0)

    out = jax.jit(lstm_encoder_pallas)(input_seq, params)
    out = jax.block_until_ready(out)

    ref = lstm_encoder_reference(input_seq, params)
    assert out.shape == (B, 128)
    assert jnp.allclose(out, ref, atol=2e-4, rtol=2e-4), "mismatch vs reference"

    print("KERNEL_OK")
</pallas_src>

<mosaic_0001>
module attributes {stable_mosaic.version = 11 : i64} {
  func.func @lstm_encoder_kernel(%arg0: memref<64x1xi32, #tpu.memory_space<vmem>>, %arg1: memref<320x512xf32, #tpu.memory_space<vmem>>, %arg2: memref<1x512xf32, #tpu.memory_space<vmem>>, %arg3: memref<128x512xf32, #tpu.memory_space<any>>, %arg4: memref<128x128xf32, #tpu.memory_space<any>>, %arg5: memref<1x128xf32, #tpu.memory_space<any>>, %arg6: memref<8x128xf32, #tpu.memory_space<vmem>>, %arg7: memref<64x512xf32, #tpu.memory_space<vmem>>, %arg8: memref<128x512xf32, #tpu.memory_space<vmem>>, %arg9: memref<128x128xf32, #tpu.memory_space<vmem>>, %arg10: memref<1x128xf32, #tpu.memory_space<vmem>>, %arg11: memref<3x!tpu.dma_semaphore, #tpu.memory_space<semaphore_mem>>) attributes {dimension_semantics = [], scalar_prefetch = 0 : i64, scratch_operands = 5 : i64, tpu.core_type = #tpu.core_type<tc>} {
    %c0_i32 = arith.constant 0 : i32
    %0 = tpu.memref_slice %arg11[%c0_i32] : memref<3x!tpu.dma_semaphore, #tpu.memory_space<semaphore_mem>> -> memref<1x!tpu.dma_semaphore, #tpu.memory_space<semaphore_mem>>
    %1 = tpu.memref_squeeze %0 : memref<1x!tpu.dma_semaphore, #tpu.memory_space<semaphore_mem>> -> memref<!tpu.dma_semaphore, #tpu.memory_space<semaphore_mem>>
    tpu.enqueue_dma source(%arg3 : memref<128x512xf32, #tpu.memory_space<any>>) target(%arg8 : memref<128x512xf32, #tpu.memory_space<vmem>>) target_semaphore(%1 : memref<!tpu.dma_semaphore, #tpu.memory_space<semaphore_mem>>)
    %c1_i32 = arith.constant 1 : i32
    %2 = tpu.memref_slice %arg11[%c1_i32] : memref<3x!tpu.dma_semaphore, #tpu.memory_space<semaphore_mem>> -> memref<1x!tpu.dma_semaphore, #tpu.memory_space<semaphore_mem>>
    %3 = tpu.memref_squeeze %2 : memref<1x!tpu.dma_semaphore, #tpu.memory_space<semaphore_mem>> -> memref<!tpu.dma_semaphore, #tpu.memory_space<semaphore_mem>>
    tpu.enqueue_dma source(%arg4 : memref<128x128xf32, #tpu.memory_space<any>>) target(%arg9 : memref<128x128xf32, #tpu.memory_space<vmem>>) target_semaphore(%3 : memref<!tpu.dma_semaphore, #tpu.memory_space<semaphore_mem>>)
    %c2_i32 = arith.constant 2 : i32
    %4 = tpu.memref_slice %arg11[%c2_i32] : memref<3x!tpu.dma_semaphore, #tpu.memory_space<semaphore_mem>> -> memref<1x!tpu.dma_semaphore, #tpu.memory_space<semaphore_mem>>
    %5 = tpu.memref_squeeze %4 : memref<1x!tpu.dma_semaphore, #tpu.memory_space<semaphore_mem>> -> memref<!tpu.dma_semaphore, #tpu.memory_space<semaphore_mem>>
    tpu.enqueue_dma source(%arg5 : memref<1x128xf32, #tpu.memory_space<any>>) target(%arg10 : memref<1x128xf32, #tpu.memory_space<vmem>>) target_semaphore(%5 : memref<!tpu.dma_semaphore, #tpu.memory_space<semaphore_mem>>)
    %c0 = arith.constant 0 : index
    %c0_0 = arith.constant 0 : index
    %6 = vector.load %arg0[%c0, %c0_0] : memref<64x1xi32, #tpu.memory_space<vmem>>, vector<64x1xi32>
    %7 = tpu.iota {dimensions = array<i32: 1>} : vector<64x320xi32>
    %8 = vector.broadcast %6 : vector<64x1xi32> to vector<64x320xi32>
    %9 = arith.cmpi eq, %8, %7 : vector<64x320xi32>
    %10 = arith.extui %9 : vector<64x320xi1> to vector<64x320xi32>
    %11 = arith.sitofp %10 : vector<64x320xi32> to vector<64x320xf32>
    %c0_1 = arith.constant 0 : index
    %c0_2 = arith.constant 0 : index
    %12 = vector.load %arg1[%c0_1, %c0_2] : memref<320x512xf32, #tpu.memory_space<vmem>>, vector<320x512xf32>
    %cst = arith.constant dense<0.000000e+00> : vector<64x512xf32>
    %13 = tpu.matmul %11, %12, %cst {dimension_numbers = #tpu.dot_dimension_numbers<[1], [0], [0], [1], [0, 0, 1, 1], [], []>} : vector<64x320xf32>, vector<320x512xf32>, vector<64x512xf32> -> vector<64x512xf32>
    %c0_3 = arith.constant 0 : index
    %c0_4 = arith.constant 0 : index
    %14 = vector.load %arg2[%c0_3, %c0_4] : memref<1x512xf32, #tpu.memory_space<vmem>>, vector<1x512xf32>
    %15 = vector.broadcast %14 : vector<1x512xf32> to vector<64x512xf32>
    %16 = arith.addf %13, %15 : vector<64x512xf32>
    %c0_5 = arith.constant 0 : index
    %c0_6 = arith.constant 0 : index
    %17 = vector.load %arg7[%c0_5, %c0_6] : memref<64x512xf32, #tpu.memory_space<vmem>>, vector<64x512xf32>
    tpu.vector_store %arg7[%c0_5, %c0_6], %16 {strides = array<i32>} : memref<64x512xf32, #tpu.memory_space<vmem>>, vector<64x512xf32>,
    %c0_i32_7 = arith.constant 0 : i32
    %18 = tpu.memref_slice %arg11[%c0_i32_7] : memref<3x!tpu.dma_semaphore, #tpu.memory_space<semaphore_mem>> -> memref<1x!tpu.dma_semaphore, #tpu.memory_space<semaphore_mem>>
    %19 = tpu.memref_squeeze %18 : memref<1x!tpu.dma_semaphore, #tpu.memory_space<semaphore_mem>> -> memref<!tpu.dma_semaphore, #tpu.memory_space<semaphore_mem>>
    tpu.wait_dma2 semaphore(%19 : memref<!tpu.dma_semaphore, #tpu.memory_space<semaphore_mem>>) src(%arg3 : memref<128x512xf32, #tpu.memory_space<any>>) dst(%arg8 : memref<128x512xf32, #tpu.memory_space<vmem>>)
    %cst_8 = arith.constant 0.000000e+00 : f32
    %20 = vector.broadcast %cst_8 : f32 to vector<8x128xf32>
    %cst_9 = arith.constant 0.000000e+00 : f32
    %21 = vector.broadcast %cst_9 : f32 to vector<8x128xf32>
    %c0_i32_10 = arith.constant 0 : i32
    %c8_i32 = arith.constant 8 : i32
    %22 = arith.muli %c0_i32_10, %c8_i32 : i32
    %23 = tpu.assume_multiple %22, 8 : i32
    %24 = arith.index_cast %23 : i32 to index
    %c0_11 = arith.constant 0 : index
    %25 = vector.load %arg7[%24, %c0_11] : memref<64x512xf32, #tpu.memory_space<vmem>>, vector<8x512xf32>
    %c0_12 = arith.constant 0 : index
    %c0_13 = arith.constant 0 : index
    %26 = vector.load %arg8[%c0_12, %c0_13] : memref<128x512xf32, #tpu.memory_space<vmem>>, vector<128x512xf32>
    %cst_14 = arith.constant dense<0.000000e+00> : vector<8x512xf32>
    %27 = tpu.matmul %20, %26, %cst_14 {dimension_numbers = #tpu.dot_dimension_numbers<[1], [0], [0], [1], [0, 0, 1, 1], [], []>} : vector<8x128xf32>, vector<128x512xf32>, vector<8x512xf32> -> vector<8x512xf32>
    %28 = arith.addf %25, %27 : vector<8x512xf32>
    %29 = vector.extract_strided_slice %28 {offsets = [0, 0], sizes = [8, 384], strides = [1, 1]} : vector<8x512xf32> to vector<8x384xf32>
    %30 = arith.negf %29 : vector<8x384xf32>
    %31 = math.exp %30 : vector<8x384xf32>
    %cst_15 = arith.constant 1.000000e+00 : f32
    %32 = vector.broadcast %cst_15 : f32 to vector<8x384xf32>
    %33 = arith.addf %32, %31 : vector<8x384xf32>
    %34 = arith.divf %32, %33 : vector<8x384xf32>
    %35 = vector.extract_strided_slice %34 {offsets = [0, 0], sizes = [8, 128], strides = [1, 1]} : vector<8x384xf32> to vector<8x128xf32>
    %36 = vector.extract_strided_slice %34 {offsets = [0, 128], sizes = [8, 128], strides = [1, 1]} : vector<8x384xf32> to vector<8x128xf32>
    %37 = vector.extract_strided_slice %34 {offsets = [0, 256], sizes = [8, 128], strides = [1, 1]} : vector<8x384xf32> to vector<8x128xf32>
    %38 = vector.extract_strided_slice %28 {offsets = [0, 384], sizes = [8, 128], strides = [1, 1]} : vector<8x512xf32> to vector<8x128xf32>
    %39 = math.tanh %38 : vector<8x128xf32>
    %40 = arith.mulf %36, %21 : vector<8x128xf32>
    %41 = arith.mulf %35, %39 : vector<8x128xf32>
    %42 = arith.addf %40, %41 : vector<8x128xf32>
    %43 = math.tanh %42 : vector<8x128xf32>
    %44 = arith.mulf %37, %43 : vector<8x128xf32>
    %c1_i32_16 = arith.constant 1 : i32
    %c8_i32_17 = arith.constant 8 : i32
    %45 = arith.muli %c1_i32_16, %c8_i32_17 : i32
    %46 = tpu.assume_multiple %45, 8 : i32
    %47 = arith.index_cast %46 : i32 to index
    %c0_18 = arith.constant 0 : index
    %48 = vector.load %arg7[%47, %c0_18] : memref<64x512xf32, #tpu.memory_space<vmem>>, vector<8x512xf32>
    %c0_19 = arith.constant 0 : index
    %c0_20 = arith.constant 0 : index
    %49 = vector.load %arg8[%c0_19, %c0_20] : memref<128x512xf32, #tpu.memory_space<vmem>>, vector<128x512xf32>
    %cst_21 = arith.constant dense<0.000000e+00> : vector<8x512xf32>
    %50 = tpu.matmul %44, %49, %cst_21 {dimension_numbers = #tpu.dot_dimension_numbers<[1], [0], [0], [1], [0, 0, 1, 1], [], []>} : vector<8x128xf32>, vector<128x512xf32>, vector<8x512xf32> -> vector<8x512xf32>
    %51 = arith.addf %48, %50 : vector<8x512xf32>
    %52 = vector.extract_strided_slice %51 {offsets = [0, 0], sizes = [8, 384], strides = [1, 1]} : vector<8x512xf32> to vector<8x384xf32>
    %53 = arith.negf %52 : vector<8x384xf32>
    %54 = math.exp %53 : vector<8x384xf32>
    %cst_22 = arith.constant 1.000000e+00 : f32
    %55 = vector.broadcast %cst_22 : f32 to vector<8x384xf32>
    %56 = arith.addf %55, %54 : vector<8x384xf32>
    %57 = arith.divf %55, %56 : vector<8x384xf32>
    %58 = vector.extract_strided_slice %57 {offsets = [0, 0], sizes = [8, 128], strides = [1, 1]} : vector<8x384xf32> to vector<8x128xf32>
    %59 = vector.extract_strided_slice %57 {offsets = [0, 128], sizes = [8, 128], strides = [1, 1]} : vector<8x384xf32> to vector<8x128xf32>
    %60 = vector.extract_strided_slice %57 {offsets = [0, 256], sizes = [8, 128], strides = [1, 1]} : vector<8x384xf32> to vector<8x128xf32>
    %61 = vector.extract_strided_slice %51 {offsets = [0, 384], sizes = [8, 128], strides = [1, 1]} : vector<8x512xf32> to vector<8x128xf32>
    %62 = math.tanh %61 : vector<8x128xf32>
    %63 = arith.mulf %59, %42 : vector<8x128xf32>
    %64 = arith.mulf %58, %62 : vector<8x128xf32>
    %65 = arith.addf %63, %64 : vector<8x128xf32>
    %66 = math.tanh %65 : vector<8x128xf32>
    %67 = arith.mulf %60, %66 : vector<8x128xf32>
    %c2_i32_23 = arith.constant 2 : i32
    %c8_i32_24 = arith.constant 8 : i32
    %68 = arith.muli %c2_i32_23, %c8_i32_24 : i32
    %69 = tpu.assume_multiple %68, 8 : i32
    %70 = arith.index_cast %69 : i32 to index
    %c0_25 = arith.constant 0 : index
    %71 = vector.load %arg7[%70, %c0_25] : memref<64x512xf32, #tpu.memory_space<vmem>>, vector<8x512xf32>
    %c0_26 = arith.constant 0 : index
    %c0_27 = arith.constant 0 : index
    %72 = vector.load %arg8[%c0_26, %c0_27] : memref<128x512xf32, #tpu.memory_space<vmem>>, vector<128x512xf32>
    %cst_28 = arith.constant dense<0.000000e+00> : vector<8x512xf32>
    %73 = tpu.matmul %67, %72, %cst_28 {dimension_numbers = #tpu.dot_dimension_numbers<[1], [0], [0], [1], [0, 0, 1, 1], [], []>} : vector<8x128xf32>, vector<128x512xf32>, vector<8x512xf32> -> vector<8x512xf32>
    %74 = arith.addf %71, %73 : vector<8x512xf32>
    %75 = vector.extract_strided_slice %74 {offsets = [0, 0], sizes = [8, 384], strides = [1, 1]} : vector<8x512xf32> to vector<8x384xf32>
    %76 = arith.negf %75 : vector<8x384xf32>
    %77 = math.exp %76 : vector<8x384xf32>
    %cst_29 = arith.constant 1.000000e+00 : f32
    %78 = vector.broadcast %cst_29 : f32 to vector<8x384xf32>
    %79 = arith.addf %78, %77 : vector<8x384xf32>
    %80 = arith.divf %78, %79 : vector<8x384xf32>
    %81 = vector.extract_strided_slice %80 {offsets = [0, 0], sizes = [8, 128], strides = [1, 1]} : vector<8x384xf32> to vector<8x128xf32>
    %82 = vector.extract_strided_slice %80 {offsets = [0, 128], sizes = [8, 128], strides = [1, 1]} : vector<8x384xf32> to vector<8x128xf32>
    %83 = vector.extract_strided_slice %80 {offsets = [0, 256], sizes = [8, 128], strides = [1, 1]} : vector<8x384xf32> to vector<8x128xf32>
    %84 = vector.extract_strided_slice %74 {offsets = [0, 384], sizes = [8, 128], strides = [1, 1]} : vector<8x512xf32> to vector<8x128xf32>
    %85 = math.tanh %84 : vector<8x128xf32>
    %86 = arith.mulf %82, %65 : vector<8x128xf32>
    %87 = arith.mulf %81, %85 : vector<8x128xf32>
    %88 = arith.addf %86, %87 : vector<8x128xf32>
    %89 = math.tanh %88 : vector<8x128xf32>
    %90 = arith.mulf %83, %89 : vector<8x128xf32>
    %c3_i32 = arith.constant 3 : i32
    %c8_i32_30 = arith.constant 8 : i32
    %91 = arith.muli %c3_i32, %c8_i32_30 : i32
    %92 = tpu.assume_multiple %91, 8 : i32
    %93 = arith.index_cast %92 : i32 to index
    %c0_31 = arith.constant 0 : index
    %94 = vector.load %arg7[%93, %c0_31] : memref<64x512xf32, #tpu.memory_space<vmem>>, vector<8x512xf32>
    %c0_32 = arith.constant 0 : index
    %c0_33 = arith.constant 0 : index
    %95 = vector.load %arg8[%c0_32, %c0_33] : memref<128x512xf32, #tpu.memory_space<vmem>>, vector<128x512xf32>
    %cst_34 = arith.constant dense<0.000000e+00> : vector<8x512xf32>
    %96 = tpu.matmul %90, %95, %cst_34 {dimension_numbers = #tpu.dot_dimension_numbers<[1], [0], [0], [1], [0, 0, 1, 1], [], []>} : vector<8x128xf32>, vector<128x512xf32>, vector<8x512xf32> -> vector<8x512xf32>
    %97 = arith.addf %94, %96 : vector<8x512xf32>
    %98 = vector.extract_strided_slice %97 {offsets = [0, 0], sizes = [8, 384], strides = [1, 1]} : vector<8x512xf32> to vector<8x384xf32>
    %99 = arith.negf %98 : vector<8x384xf32>
    %100 = math.exp %99 : vector<8x384xf32>
    %cst_35 = arith.constant 1.000000e+00 : f32
    %101 = vector.broadcast %cst_35 : f32 to vector<8x384xf32>
    %102 = arith.addf %101, %100 : vector<8x384xf32>
    %103 = arith.divf %101, %102 : vector<8x384xf32>
    %104 = vector.extract_strided_slice %103 {offsets = [0, 0], sizes = [8, 128], strides = [1, 1]} : vector<8x384xf32> to vector<8x128xf32>
    %105 = vector.extract_strided_slice %103 {offsets = [0, 128], sizes = [8, 128], strides = [1, 1]} : vector<8x384xf32> to vector<8x128xf32>
    %106 = vector.extract_strided_slice %103 {offsets = [0, 256], sizes = [8, 128], strides = [1, 1]} : vector<8x384xf32> to vector<8x128xf32>
    %107 = vector.extract_strided_slice %97 {offsets = [0, 384], sizes = [8, 128], strides = [1, 1]} : vector<8x512xf32> to vector<8x128xf32>
    %108 = math.tanh %107 : vector<8x128xf32>
    %109 = arith.mulf %105, %88 : vector<8x128xf32>
    %110 = arith.mulf %104, %108 : vector<8x128xf32>
    %111 = arith.addf %109, %110 : vector<8x128xf32>
    %112 = math.tanh %111 : vector<8x128xf32>
    %113 = arith.mulf %106, %112 : vector<8x128xf32>
    %c4_i32 = arith.constant 4 : i32
    %c8_i32_36 = arith.constant 8 : i32
    %114 = arith.muli %c4_i32, %c8_i32_36 : i32
    %115 = tpu.assume_multiple %114, 8 : i32
    %116 = arith.index_cast %115 : i32 to index
    %c0_37 = arith.constant 0 : index
    %117 = vector.load %arg7[%116, %c0_37] : memref<64x512xf32, #tpu.memory_space<vmem>>, vector<8x512xf32>
    %c0_38 = arith.constant 0 : index
    %c0_39 = arith.constant 0 : index
    %118 = vector.load %arg8[%c0_38, %c0_39] : memref<128x512xf32, #tpu.memory_space<vmem>>, vector<128x512xf32>
    %cst_40 = arith.constant dense<0.000000e+00> : vector<8x512xf32>
    %119 = tpu.matmul %113, %118, %cst_40 {dimension_numbers = #tpu.dot_dimension_numbers<[1], [0], [0], [1], [0, 0, 1, 1], [], []>} : vector<8x128xf32>, vector<128x512xf32>, vector<8x512xf32> -> vector<8x512xf32>
    %120 = arith.addf %117, %119 : vector<8x512xf32>
    %121 = vector.extract_strided_slice %120 {offsets = [0, 0], sizes = [8, 384], strides = [1, 1]} : vector<8x512xf32> to vector<8x384xf32>
    %122 = arith.negf %121 : vector<8x384xf32>
    %123 = math.exp %122 : vector<8x384xf32>
    %cst_41 = arith.constant 1.000000e+00 : f32
    %124 = vector.broadcast %cst_41 : f32 to vector<8x384xf32>
    %125 = arith.addf %124, %123 : vector<8x384xf32>
    %126 = arith.divf %124, %125 : vector<8x384xf32>
    %127 = vector.extract_strided_slice %126 {offsets = [0, 0], sizes = [8, 128], strides = [1, 1]} : vector<8x384xf32> to vector<8x128xf32>
    %128 = vector.extract_strided_slice %126 {offsets = [0, 128], sizes = [8, 128], strides = [1, 1]} : vector<8x384xf32> to vector<8x128xf32>
    %129 = vector.extract_strided_slice %126 {offsets = [0, 256], sizes = [8, 128], strides = [1, 1]} : vector<8x384xf32> to vector<8x128xf32>
    %130 = vector.extract_strided_slice %120 {offsets = [0, 384], sizes = [8, 128], strides = [1, 1]} : vector<8x512xf32> to vector<8x128xf32>
    %131 = math.tanh %130 : vector<8x128xf32>
    %132 = arith.mulf %128, %111 : vector<8x128xf32>
    %133 = arith.mulf %127, %131 : vector<8x128xf32>
    %134 = arith.addf %132, %133 : vector<8x128xf32>
    %135 = math.tanh %134 : vector<8x128xf32>
    %136 = arith.mulf %129, %135 : vector<8x128xf32>
    %c5_i32 = arith.constant 5 : i32
    %c8_i32_42 = arith.constant 8 : i32
    %137 = arith.muli %c5_i32, %c8_i32_42 : i32
    %138 = tpu.assume_multiple %137, 8 : i32
    %139 = arith.index_cast %138 : i32 to index
    %c0_43 = arith.constant 0 : index
    %140 = vector.load %arg7[%139, %c0_43] : memref<64x512xf32, #tpu.memory_space<vmem>>, vector<8x512xf32>
    %c0_44 = arith.constant 0 : index
    %c0_45 = arith.constant 0 : index
    %141 = vector.load %arg8[%c0_44, %c0_45] : memref<128x512xf32, #tpu.memory_space<vmem>>, vector<128x512xf32>
    %cst_46 = arith.constant dense<0.000000e+00> : vector<8x512xf32>
    %142 = tpu.matmul %136, %141, %cst_46 {dimension_numbers = #tpu.dot_dimension_numbers<[1], [0], [0], [1], [0, 0, 1, 1], [], []>} : vector<8x128xf32>, vector<128x512xf32>, vector<8x512xf32> -> vector<8x512xf32>
    %143 = arith.addf %140, %142 : vector<8x512xf32>
    %144 = vector.extract_strided_slice %143 {offsets = [0, 0], sizes = [8, 384], strides = [1, 1]} : vector<8x512xf32> to vector<8x384xf32>
    %145 = arith.negf %144 : vector<8x384xf32>
    %146 = math.exp %145 : vector<8x384xf32>
    %cst_47 = arith.constant 1.000000e+00 : f32
    %147 = vector.broadcast %cst_47 : f32 to vector<8x384xf32>
    %148 = arith.addf %147, %146 : vector<8x384xf32>
    %149 = arith.divf %147, %148 : vector<8x384xf32>
    %150 = vector.extract_strided_slice %149 {offsets = [0, 0], sizes = [8, 128], strides = [1, 1]} : vector<8x384xf32> to vector<8x128xf32>
    %151 = vector.extract_strided_slice %149 {offsets = [0, 128], sizes = [8, 128], strides = [1, 1]} : vector<8x384xf32> to vector<8x128xf32>
    %152 = vector.extract_strided_slice %149 {offsets = [0, 256], sizes = [8, 128], strides = [1, 1]} : vector<8x384xf32> to vector<8x128xf32>
    %153 = vector.extract_strided_slice %143 {offsets = [0, 384], sizes = [8, 128], strides = [1, 1]} : vector<8x512xf32> to vector<8x128xf32>
    %154 = math.tanh %153 : vector<8x128xf32>
    %155 = arith.mulf %151, %134 : vector<8x128xf32>
    %156 = arith.mulf %150, %154 : vector<8x128xf32>
    %157 = arith.addf %155, %156 : vector<8x128xf32>
    %158 = math.tanh %157 : vector<8x128xf32>
    %159 = arith.mulf %152, %158 : vector<8x128xf32>
    %c6_i32 = arith.constant 6 : i32
    %c8_i32_48 = arith.constant 8 : i32
    %160 = arith.muli %c6_i32, %c8_i32_48 : i32
    %161 = tpu.assume_multiple %160, 8 : i32
    %162 = arith.index_cast %161 : i32 to index
    %c0_49 = arith.constant 0 : index
    %163 = vector.load %arg7[%162, %c0_49] : memref<64x512xf32, #tpu.memory_space<vmem>>, vector<8x512xf32>
    %c0_50 = arith.constant 0 : index
    %c0_51 = arith.constant 0 : index
    %164 = vector.load %arg8[%c0_50, %c0_51] : memref<128x512xf32, #tpu.memory_space<vmem>>, vector<128x512xf32>
    %cst_52 = arith.constant dense<0.000000e+00> : vector<8x512xf32>
    %165 = tpu.matmul %159, %164, %cst_52 {dimension_numbers = #tpu.dot_dimension_numbers<[1], [0], [0], [1], [0, 0, 1, 1], [], []>} : vector<8x128xf32>, vector<128x512xf32>, vector<8x512xf32> -> vector<8x512xf32>
    %166 = arith.addf %163, %165 : vector<8x512xf32>
    %167 = vector.extract_strided_slice %166 {offsets = [0, 0], sizes = [8, 384], strides = [1, 1]} : vector<8x512xf32> to vector<8x384xf32>
    %168 = arith.negf %167 : vector<8x384xf32>
    %169 = math.exp %168 : vector<8x384xf32>
    %cst_53 = arith.constant 1.000000e+00 : f32
    %170 = vector.broadcast %cst_53 : f32 to vector<8x384xf32>
    %171 = arith.addf %170, %169 : vector<8x384xf32>
    %172 = arith.divf %170, %171 : vector<8x384xf32>
    %173 = vector.extract_strided_slice %172 {offsets = [0, 0], sizes = [8, 128], strides = [1, 1]} : vector<8x384xf32> to vector<8x128xf32>
    %174 = vector.extract_strided_slice %172 {offsets = [0, 128], sizes = [8, 128], strides = [1, 1]} : vector<8x384xf32> to vector<8x128xf32>
    %175 = vector.extract_strided_slice %172 {offsets = [0, 256], sizes = [8, 128], strides = [1, 1]} : vector<8x384xf32> to vector<8x128xf32>
    %176 = vector.extract_strided_slice %166 {offsets = [0, 384], sizes = [8, 128], strides = [1, 1]} : vector<8x512xf32> to vector<8x128xf32>
    %177 = math.tanh %176 : vector<8x128xf32>
    %178 = arith.mulf %174, %157 : vector<8x128xf32>
    %179 = arith.mulf %173, %177 : vector<8x128xf32>
    %180 = arith.addf %178, %179 : vector<8x128xf32>
    %181 = math.tanh %180 : vector<8x128xf32>
    %182 = arith.mulf %175, %181 : vector<8x128xf32>
    %c7_i32 = arith.constant 7 : i32
    %c8_i32_54 = arith.constant 8 : i32
    %183 = arith.muli %c7_i32, %c8_i32_54 : i32
    %184 = tpu.assume_multiple %183, 8 : i32
    %185 = arith.index_cast %184 : i32 to index
    %c0_55 = arith.constant 0 : index
    %186 = vector.load %arg7[%185, %c0_55] : memref<64x512xf32, #tpu.memory_space<vmem>>, vector<8x512xf32>
    %c0_56 = arith.constant 0 : index
    %c0_57 = arith.constant 0 : index
    %187 = vector.load %arg8[%c0_56, %c0_57] : memref<128x512xf32, #tpu.memory_space<vmem>>, vector<128x512xf32>
    %cst_58 = arith.constant dense<0.000000e+00> : vector<8x512xf32>
    %188 = tpu.matmul %182, %187, %cst_58 {dimension_numbers = #tpu.dot_dimension_numbers<[1], [0], [0], [1], [0, 0, 1, 1], [], []>} : vector<8x128xf32>, vector<128x512xf32>, vector<8x512xf32> -> vector<8x512xf32>
    %189 = arith.addf %186, %188 : vector<8x512xf32>
    %190 = vector.extract_strided_slice %189 {offsets = [0, 0], sizes = [8, 384], strides = [1, 1]} : vector<8x512xf32> to vector<8x384xf32>
    %191 = arith.negf %190 : vector<8x384xf32>
    %192 = math.exp %191 : vector<8x384xf32>
    %cst_59 = arith.constant 1.000000e+00 : f32
    %193 = vector.broadcast %cst_59 : f32 to vector<8x384xf32>
    %194 = arith.addf %193, %192 : vector<8x384xf32>
    %195 = arith.divf %193, %194 : vector<8x384xf32>
    %196 = vector.extract_strided_slice %195 {offsets = [0, 0], sizes = [8, 128], strides = [1, 1]} : vector<8x384xf32> to vector<8x128xf32>
    %197 = vector.extract_strided_slice %195 {offsets = [0, 128], sizes = [8, 128], strides = [1, 1]} : vector<8x384xf32> to vector<8x128xf32>
    %198 = vector.extract_strided_slice %195 {offsets = [0, 256], sizes = [8, 128], strides = [1, 1]} : vector<8x384xf32> to vector<8x128xf32>
    %199 = vector.extract_strided_slice %189 {offsets = [0, 384], sizes = [8, 128], strides = [1, 1]} : vector<8x512xf32> to vector<8x128xf32>
    %200 = math.tanh %199 : vector<8x128xf32>
    %201 = arith.mulf %197, %180 : vector<8x128xf32>
    %202 = arith.mulf %196, %200 : vector<8x128xf32>
    %203 = arith.addf %201, %202 : vector<8x128xf32>
    %204 = math.tanh %203 : vector<8x128xf32>
    %205 = arith.mulf %198, %204 : vector<8x128xf32>
    %c8_i32_60 = arith.constant 8 : i32
    %c1_i32_61 = arith.constant 1 : i32
    %206 = tpu.memref_slice %arg11[%c1_i32_61] : memref<3x!tpu.dma_semaphore, #tpu.memory_space<semaphore_mem>> -> memref<1x!tpu.dma_semaphore, #tpu.memory_space<semaphore_mem>>
    %207 = tpu.memref_squeeze %206 : memref<1x!tpu.dma_semaphore, #tpu.memory_space<semaphore_mem>> -> memref<!tpu.dma_semaphore, #tpu.memory_space<semaphore_mem>>
    tpu.wait_dma2 semaphore(%207 : memref<!tpu.dma_semaphore, #tpu.memory_space<semaphore_mem>>) src(%arg4 : memref<128x128xf32, #tpu.memory_space<any>>) dst(%arg9 : memref<128x128xf32, #tpu.memory_space<vmem>>)
    %c2_i32_62 = arith.constant 2 : i32
    %208 = tpu.memref_slice %arg11[%c2_i32_62] : memref<3x!tpu.dma_semaphore, #tpu.memory_space<semaphore_mem>> -> memref<1x!tpu.dma_semaphore, #tpu.memory_space<semaphore_mem>>
    %209 = tpu.memref_squeeze %208 : memref<1x!tpu.dma_semaphore, #tpu.memory_space<semaphore_mem>> -> memref<!tpu.dma_semaphore, #tpu.memory_space<semaphore_mem>>
    tpu.wait_dma2 semaphore(%209 : memref<!tpu.dma_semaphore, #tpu.memory_space<semaphore_mem>>) src(%arg5 : memref<1x128xf32, #tpu.memory_space<any>>) dst(%arg10 : memref<1x128xf32, #tpu.memory_space<vmem>>)
    %c0_63 = arith.constant 0 : index
    %c0_64 = arith.constant 0 : index
    %210 = vector.load %arg9[%c0_63, %c0_64] : memref<128x128xf32, #tpu.memory_space<vmem>>, vector<128x128xf32>
    %cst_65 = arith.constant dense<0.000000e+00> : vector<8x128xf32>
    %211 = tpu.matmul %205, %210, %cst_65 {dimension_numbers = #tpu.dot_dimension_numbers<[1], [0], [0], [1], [0, 0, 1, 1], [], []>} : vector<8x128xf32>, vector<128x128xf32>, vector<8x128xf32> -> vector<8x128xf32>
    %c0_66 = arith.constant 0 : index
    %c0_67 = arith.constant 0 : index
    %212 = vector.load %arg10[%c0_66, %c0_67] : memref<1x128xf32, #tpu.memory_space<vmem>>, vector<1x128xf32>
    %213 = vector.broadcast %212 : vector<1x128xf32> to vector<8x128xf32>
    %214 = arith.addf %211, %213 : vector<8x128xf32>
    %c0_68 = arith.constant 0 : index
    %c0_69 = arith.constant 0 : index
    %215 = vector.load %arg6[%c0_68, %c0_69] : memref<8x128xf32, #tpu.memory_space<vmem>>, vector<8x128xf32>
    tpu.vector_store %arg6[%c0_68, %c0_69], %214 {strides = array<i32>} : memref<8x128xf32, #tpu.memory_space<vmem>>, vector<8x128xf32>,
    return
  }
}

</mosaic_0001>

<bundles_post_ra>
// kernel: lstm_encoder_pallas.1
= control target key start
LH: loop header
LB: loop body
LE: loop exit
PB: predicated region body
PF: predicated region fallthrough
CT: control target
= control target key end

     0   :  { %11 = vsyncpa [#allocation8], 0  ;;  %s5625_s0 = inlined_call_operand.vmem [shape: s32[64,1], index: 0, kind: input, shape index: {}]   ;;  %s5626_s1 = inlined_call_operand.vmem [shape: f32[320,512], index: 1, kind: input, shape index: {}]   ;;  %s5627_s2 = inlined_call_operand.vmem [shape: f32[1,512], index: 2, kind: input, shape index: {}]   ;;  %s5628_s3 = inlined_call_operand.vmem [shape: f32[128,512], index: 3, kind: input, shape index: {}]   ;;  %s5629_s4 = inlined_call_operand.vmem [shape: f32[128,128], index: 4, kind: input, shape index: {}]   ;;  %s5630_s5 = inlined_call_operand.vmem [shape: f32[1,128], index: 5, kind: input, shape index: {}]   ;;  %s5631_s6 = inlined_call_operand.hbm [shape: f32[8,128], index: 6, kind: output, shape index: {}]  }
   0x1   :  { %v3908_v0 = vld [vmem:[%s5628_s3] sm:$0xff]  ;;  %v3913_v1 = vld [vmem:[%s5628_s3 + $0x8] sm:$0xff]  ;;  %v3918_v2 = vld [vmem:[%s5628_s3 + $0x10] sm:$0xff] }
   0x2   :  { %v3923_v3 = vld [vmem:[%s5628_s3 + $0x18] sm:$0xff]  ;;  %v3928_v4 = vld [vmem:[%s5628_s3 + $0x20] sm:$0xff]  ;;  %v3933_v5 = vld [vmem:[%s5628_s3 + $0x28] sm:$0xff] }
   0x3   :  { %v3938_v6 = vld [vmem:[%s5628_s3 + $0x30] sm:$0xff]  ;;  %v3943_v7 = vld [vmem:[%s5628_s3 + $0x38] sm:$0xff]  ;;  %v3948_v8 = vld [vmem:[%s5628_s3 + $0x40] sm:$0xff] }
   0x4   :  { %v3953_v9 = vld [vmem:[%s5628_s3 + $0x48] sm:$0xff]  ;;  %v3958_v10 = vld [vmem:[%s5628_s3 + $0x50] sm:$0xff]  ;;  %v3963_v11 = vld [vmem:[%s5628_s3 + $0x58] sm:$0xff] }
   0x5   :  { %v3968_v12 = vld [vmem:[%s5628_s3 + $0x60] sm:$0xff]  ;;  %v3973_v13 = vld [vmem:[%s5628_s3 + $0x68] sm:$0xff]  ;;  %v3978_v14 = vld [vmem:[%s5628_s3 + $0x70] sm:$0xff] }
   0x6   :  { %v3983_v15 = vld [vmem:[%s5628_s3 + $0x78] sm:$0xff]  ;;  %v3988_v16 = vld [vmem:[%s5628_s3 + $0x80] sm:$0xff]  ;;  %v3993_v17 = vld [vmem:[%s5628_s3 + $0x88] sm:$0xff] }
   0x7   :  { %v3998_v18 = vld [vmem:[%s5628_s3 + $0x90] sm:$0xff]  ;;  %v4003_v19 = vld [vmem:[%s5628_s3 + $0x98] sm:$0xff]  ;;  %v4008_v20 = vld [vmem:[%s5628_s3 + $0xa0] sm:$0xff] }
   0x8   :  { %v4013_v21 = vld [vmem:[%s5628_s3 + $0xa8] sm:$0xff]  ;;  %v4018_v22 = vld [vmem:[%s5628_s3 + $0xb0] sm:$0xff]  ;;  %v4023_v23 = vld [vmem:[%s5628_s3 + $0xb8] sm:$0xff] }
   0x9   :  { %v4028_v24 = vld [vmem:[%s5628_s3 + $0xc0] sm:$0xff]  ;;  %v4033_v25 = vld [vmem:[%s5628_s3 + $0xc8] sm:$0xff]  ;;  %v4038_v26 = vld [vmem:[%s5628_s3 + $0xd0] sm:$0xff] }
   0xa   :  { %5640 = vst [vmem:[#allocation16_spill] sm:$0xff] %v4038_v26  ;;  %v4043_v27 = vld [vmem:[%s5628_s3 + $0xd8] sm:$0xff]  ;;  %v4048_v28 = vld [vmem:[%s5628_s3 + $0xe0] sm:$0xff]  ;;  %v4053_v29 = vld [vmem:[%s5628_s3 + $0xe8] sm:$0xff] }
   0xb   :  { %v4058_v30 = vld [vmem:[%s5628_s3 + $0xf0] sm:$0xff]  ;;  %v4063_v31 = vld [vmem:[%s5628_s3 + $0xf8] sm:$0xff]  ;;  %v4068_v32 = vld [vmem:[%s5628_s3 + $0x100] sm:$0xff] }
   0xc   :  { %5641 = vst [vmem:[#allocation17_spill] sm:$0xff] %v4058_v30  ;;  %5642 = vst [vmem:[#allocation18_spill] sm:$0xff] %v4068_v32  ;;  %v4073_v33 = vld [vmem:[%s5628_s3 + $0x108] sm:$0xff]  ;;  %v4078_v34 = vld [vmem:[%s5628_s3 + $0x110] sm:$0xff] }
   0xd   :  { %5643 = vst [vmem:[#allocation19_spill] sm:$0xff] %v4073_v33  ;;  %5644 = vst [vmem:[#allocation20_spill] sm:$0xff] %v4078_v34  ;;  %v4083_v35 = vld [vmem:[%s5628_s3 + $0x118] sm:$0xff]  ;;  %v4088_v36 = vld [vmem:[%s5628_s3 + $0x120] sm:$0xff] }
   0xe   :  { %5645 = vst [vmem:[#allocation21_spill] sm:$0xff] %v4083_v35  ;;  %5646 = vst [vmem:[#allocation22_spill] sm:$0xff] %v4088_v36  ;;  %v4093_v37 = vld [vmem:[%s5628_s3 + $0x128] sm:$0xff]  ;;  %v4098_v38 = vld [vmem:[%s5628_s3 + $0x130] sm:$0xff] }
   0xf   :  { %5647 = vst [vmem:[#allocation23_spill] sm:$0xff] %v4093_v37  ;;  %5648 = vst [vmem:[#allocation24_spill] sm:$0xff] %v4098_v38  ;;  %v4103_v39 = vld [vmem:[%s5628_s3 + $0x138] sm:$0xff]  ;;  %v4108_v40 = vld [vmem:[%s5628_s3 + $0x140] sm:$0xff] }
  0x10   :  { %5649 = vst [vmem:[#allocation25_spill] sm:$0xff] %v4103_v39  ;;  %5650 = vst [vmem:[#allocation26_spill] sm:$0xff] %v4108_v40  ;;  %v4113_v41 = vld [vmem:[%s5628_s3 + $0x148] sm:$0xff]  ;;  %v4118_v42 = vld [vmem:[%s5628_s3 + $0x150] sm:$0xff] }
  0x11   :  { %5651 = vst [vmem:[#allocation27_spill] sm:$0xff] %v4113_v41  ;;  %5652 = vst [vmem:[#allocation28_spill] sm:$0xff] %v4118_v42  ;;  %v4123_v43 = vld [vmem:[%s5628_s3 + $0x158] sm:$0xff]  ;;  %v4128_v44 = vld [vmem:[%s5628_s3 + $0x160] sm:$0xff] }
  0x12   :  { %5653 = vst [vmem:[#allocation29_spill] sm:$0xff] %v4123_v43  ;;  %5654 = vst [vmem:[#allocation30_spill] sm:$0xff] %v4128_v44  ;;  %v4133_v45 = vld [vmem:[%s5628_s3 + $0x168] sm:$0xff]  ;;  %v4138_v46 = vld [vmem:[%s5628_s3 + $0x170] sm:$0xff] }
  0x13   :  { %5655 = vst [vmem:[#allocation31_spill] sm:$0xff] %v4133_v45  ;;  %5656 = vst [vmem:[#allocation32_spill] sm:$0xff] %v4138_v46  ;;  %v4143_v47 = vld [vmem:[%s5628_s3 + $0x178] sm:$0xff]  ;;  %v4148_v48 = vld [vmem:[%s5628_s3 + $0x180] sm:$0xff] }
  0x14   :  { %5657 = vst [vmem:[#allocation33_spill] sm:$0xff] %v4143_v47  ;;  %5658 = vst [vmem:[#allocation34_spill] sm:$0xff] %v4148_v48  ;;  %v4153_v49 = vld [vmem:[%s5628_s3 + $0x188] sm:$0xff]  ;;  %v4158_v50 = vld [vmem:[%s5628_s3 + $0x190] sm:$0xff] }
  0x15   :  { %5659 = vst [vmem:[#allocation35_spill] sm:$0xff] %v4153_v49  ;;  %5660 = vst [vmem:[#allocation36_spill] sm:$0xff] %v4158_v50  ;;  %v4163_v51 = vld [vmem:[%s5628_s3 + $0x198] sm:$0xff]  ;;  %v4168_v52 = vld [vmem:[%s5628_s3 + $0x1a0] sm:$0xff] }
  0x16   :  { %5661 = vst [vmem:[#allocation37_spill] sm:$0xff] %v4163_v51  ;;  %5662 = vst [vmem:[#allocation38_spill] sm:$0xff] %v4168_v52  ;;  %v4173_v53 = vld [vmem:[%s5628_s3 + $0x1a8] sm:$0xff]  ;;  %v4178_v54 = vld [vmem:[%s5628_s3 + $0x1b0] sm:$0xff] }
  0x17   :  { %5663 = vst [vmem:[#allocation39_spill] sm:$0xff] %v4173_v53  ;;  %5664 = vst [vmem:[#allocation40_spill] sm:$0xff] %v4178_v54  ;;  %v4183_v55 = vld [vmem:[%s5628_s3 + $0x1b8] sm:$0xff]  ;;  %v4188_v56 = vld [vmem:[%s5628_s3 + $0x1c0] sm:$0xff] }
  0x18   :  { %5665 = vst [vmem:[#allocation41_spill] sm:$0xff] %v4183_v55  ;;  %5666 = vst [vmem:[#allocation42_spill] sm:$0xff] %v4188_v56  ;;  %v4193_v57 = vld [vmem:[%s5628_s3 + $0x1c8] sm:$0xff]  ;;  %v4198_v58 = vld [vmem:[%s5628_s3 + $0x1d0] sm:$0xff] }
  0x19   :  { %5667 = vst [vmem:[#allocation43_spill] sm:$0xff] %v4193_v57  ;;  %5668 = vst [vmem:[#allocation44_spill] sm:$0xff] %v4198_v58  ;;  %v4203_v59 = vld [vmem:[%s5628_s3 + $0x1d8] sm:$0xff]  ;;  %v4208_v60 = vld [vmem:[%s5628_s3 + $0x1e0] sm:$0xff] }
  0x1a   :  { %5669 = vst [vmem:[#allocation45_spill] sm:$0xff] %v4203_v59  ;;  %5670 = vst [vmem:[#allocation46_spill] sm:$0xff] %v4208_v60  ;;  %v4213_v61 = vld [vmem:[%s5628_s3 + $0x1e8] sm:$0xff]  ;;  %v4218_v62 = vld [vmem:[%s5628_s3 + $0x1f0] sm:$0xff] }
  0x1b   :  { %5671 = vst [vmem:[#allocation47_spill] sm:$0xff] %v4213_v61  ;;  %5672 = vst [vmem:[#allocation48_spill] sm:$0xff] %v4218_v62  ;;  %v4223_v63 = vld [vmem:[%s5628_s3 + $0x1f8] sm:$0xff] }
  0x1c   :  { %5673 = vst [vmem:[#allocation49_spill] sm:$0xff] %v4223_v63 }
  0x1d   :  { %185 = vsyncadd [#allocation6], 8192  ;;  %v4228_v58 = vld [vmem:[%s5629_s4] sm:$0xff]  ;;  %v4233_v60 = vld [vmem:[%s5629_s4 + $0x8] sm:$0xff] }
  0x1e   :  { %5674 = vst [vmem:[#allocation50_spill] sm:$0xff] %v4228_v58  ;;  %5675 = vst [vmem:[#allocation51_spill] sm:$0xff] %v4233_v60  ;;  %v4238_v62 = vld [vmem:[%s5629_s4 + $0x10] sm:$0xff]  ;;  %v4243_v56 = vld [vmem:[%s5629_s4 + $0x18] sm:$0xff] }
  0x1f   :  { %5676 = vst [vmem:[#allocation52_spill] sm:$0xff] %v4238_v62  ;;  %5677 = vst [vmem:[#allocation53_spill] sm:$0xff] %v4243_v56  ;;  %v4248_v63 = vld [vmem:[%s5629_s4 + $0x20] sm:$0xff]  ;;  %v4253_v58 = vld [vmem:[%s5629_s4 + $0x28] sm:$0xff] }
  0x20   :  { %5678 = vst [vmem:[#allocation54_spill] sm:$0xff] %v4248_v63  ;;  %5679 = vst [vmem:[#allocation55_spill] sm:$0xff] %v4253_v58  ;;  %v4258_v60 = vld [vmem:[%s5629_s4 + $0x30] sm:$0xff]  ;;  %v4263_v62 = vld [vmem:[%s5629_s4 + $0x38] sm:$0xff] }
  0x21   :  { %5680 = vst [vmem:[#allocation56_spill] sm:$0xff] %v4258_v60  ;;  %5681 = vst [vmem:[#allocation57_spill] sm:$0xff] %v4263_v62  ;;  %v4268_v56 = vld [vmem:[%s5629_s4 + $0x40] sm:$0xff]  ;;  %v4273_v63 = vld [vmem:[%s5629_s4 + $0x48] sm:$0xff] }
  0x22   :  { %5682 = vst [vmem:[#allocation58_spill] sm:$0xff] %v4268_v56  ;;  %5683 = vst [vmem:[#allocation59_spill] sm:$0xff] %v4273_v63  ;;  %v4278_v58 = vld [vmem:[%s5629_s4 + $0x50] sm:$0xff]  ;;  %v4283_v60 = vld [vmem:[%s5629_s4 + $0x58] sm:$0xff] }
  0x23   :  { %5684 = vst [vmem:[#allocation60_spill] sm:$0xff] %v4278_v58  ;;  %5685 = vst [vmem:[#allocation61_spill] sm:$0xff] %v4283_v60  ;;  %v4288_v62 = vld [vmem:[%s5629_s4 + $0x60] sm:$0xff]  ;;  %v4293_v56 = vld [vmem:[%s5629_s4 + $0x68] sm:$0xff] }
  0x24   :  { %5686 = vst [vmem:[#allocation62_spill] sm:$0xff] %v4288_v62  ;;  %5687 = vst [vmem:[#allocation63_spill] sm:$0xff] %v4293_v56  ;;  %v4298_v63 = vld [vmem:[%s5629_s4 + $0x70] sm:$0xff]  ;;  %v4303_v58 = vld [vmem:[%s5629_s4 + $0x78] sm:$0xff] }
  0x25   :  { %5688 = vst [vmem:[#allocation64_spill] sm:$0xff] %v4298_v63  ;;  %5689 = vst [vmem:[#allocation65_spill] sm:$0xff] %v4303_v58 }
  0x26   :  { %258 = vsyncadd [#allocation6 + $0x1], 2048  ;;  %v277_v62 = vld [vmem:[%s5630_s5] sm:$0x1]  ;;  %v306_v56 = vld [vmem:[%s5625_s0 + $0x10] sm:$0xff]  ;;  %v3864_v63 = vmov 0  }
  0x27   :  { %278 = vst [vmem:[#allocation5] sm:$0x1] %v277_v62  ;;  %v304_v60 = vld [vmem:[%s5625_s0] sm:$0xff]  ;;  %3705 = vset.pattern.permute.xlu1 %v3864_v63  ;;  %3704 = vset.pattern.permute.xlu0 %v3864_v63  ;;  %v307_v58 = vld [vmem:[%s5625_s0 + $0x18] sm:$0xff]  ;;  %v305_v62 = vld [vmem:[%s5625_s0 + $0x8] sm:$0xff] }
  0x28   :  { %323 = vperm.xlu1 %3705, %v306_v56   ;;  %317 = vperm.xlu0 %3704, %v304_v60  }
  0x29   :  { %303 = vsyncadd [#allocation6 + $0x2], 16  ;;  %v413_v59 = vld [vmem:[%s5626_s1 + $0x8] sm:$0xff]  ;;  %v412_v56 = vld [vmem:[%s5626_s1] sm:$0xff]  ;;  %v5632_v57 = vmov 0.0   ;;  %vm594_vm0 = vcmask 523264  }
  0x2a   :  { %v417_v54 = vld [vmem:[%s5626_s1 + $0x28] sm:$0xff]  ;;  %v416_v63 = vld [vmem:[%s5626_s1 + $0x20] sm:$0xff]  ;;  %796 = vmatprep.mubr.f32.mxu1 %v5632_v57  ;;  %v446_v34 = vld [vmem:[%s5626_s1 + $0x110] sm:$0xff] }
  0x2b   :  { %v2906_v60 = vpack.c.bf16 %v417_v54, %v413_v59  ;;  %v421_v50 = vld [vmem:[%s5626_s1 + $0x48] sm:$0xff]  ;;  %v2908_v52 = vpack.c.bf16 %v416_v63, %v412_v56  ;;  %v420_v54 = vld [vmem:[%s5626_s1 + $0x40] sm:$0xff]  ;;  %v450_v45 = vld [vmem:[%s5626_s1 + $0x130] sm:$0xff] }
  0x2c   :  { %v425_v61 = vld [vmem:[%s5626_s1 + $0x68] sm:$0xff]  ;;  %v424_v59 = vld [vmem:[%s5626_s1 + $0x60] sm:$0xff]  ;;  %326 = vperm.xlu1 %3705, %v307_v58   ;;  %320 = vperm.xlu0 %3704, %v305_v62   ;;  %v454_v41 = vld [vmem:[%s5626_s1 + $0x150] sm:$0xff] }
  0x2d   :  { %v2910_v48 = vpack.c.bf16 %v425_v61, %v421_v50  ;;  %v429_v55 = vld [vmem:[%s5626_s1 + $0x88] sm:$0xff]  ;;  %v308_v61 = vld [vmem:[%s5625_s0 + $0x20] sm:$0xff]  ;;  %2907 = vmatprep.subr.bf16.mxu0 %v2906_v60  ;;  %v2912_v58 = vpack.c.bf16 %v424_v59, %v420_v54  ;;  %v458_v36 = vld [vmem:[%s5626_s1 + $0x170] sm:$0xff] }
  0x2e   :  { %v433_v57 = vld [vmem:[%s5626_s1 + $0xa8] sm:$0xff]  ;;  %2909 = vmatpush1.bf16.msra.mxu0 %v2908_v52  ;;  %v428_v56 = vld [vmem:[%s5626_s1 + $0x80] sm:$0xff]  ;;  %v462_v32 = vld [vmem:[%s5626_s1 + $0x190] sm:$0xff] }
  0x2f   :  { %v309_v50 = vld [vmem:[%s5625_s0 + $0x28] sm:$0xff]  ;;  %2911 = vmatprep.subr.bf16.mxu0 %v2910_v48  ;;  %v2914_v62 = vpack.c.bf16 %v433_v57, %v429_v55  ;;  %v432_v63 = vld [vmem:[%s5626_s1 + $0xa0] sm:$0xff]  ;;  %v311_v48 = vld [vmem:[%s5625_s0 + $0x38] sm:$0xff] }
  0x30   :  { %332 = vperm.xlu1 %3705, %v309_v50   ;;  %329 = vperm.xlu0 %3704, %v308_v61   ;;  %v437_v51 = vld [vmem:[%s5626_s1 + $0xc8] sm:$0xff]  ;;  %v310_v55 = vld [vmem:[%s5625_s0 + $0x30] sm:$0xff]  ;;  %v2916_v57 = vpack.c.bf16 %v432_v63, %v428_v56  ;;  %v436_v54 = vld [vmem:[%s5626_s1 + $0xc0] sm:$0xff] }
  0x31   :  { %v441_v52 = vld [vmem:[%s5626_s1 + $0xe8] sm:$0xff]  ;;  %v440_v59 = vld [vmem:[%s5626_s1 + $0xe0] sm:$0xff]  ;;  %v466_v39 = vld [vmem:[%s5626_s1 + $0x1b0] sm:$0xff] }
  0x32   :  { %2913 = vmatpush1.bf16.msra.mxu0 %v2912_v58  ;;  %v2918_v60 = vpack.c.bf16 %v441_v52, %v437_v51  ;;  %v445_v50 = vld [vmem:[%s5626_s1 + $0x108] sm:$0xff]  ;;  %v2920_v51 = vpack.c.bf16 %v440_v59, %v436_v54  ;;  %v448_v56 = vld [vmem:[%s5626_s1 + $0x120] sm:$0xff]  ;;  %v470_v35 = vld [vmem:[%s5626_s1 + $0x1d0] sm:$0xff] }
  0x33   :  { %2915 = vmatprep.subr.bf16.mxu0 %v2914_v62  ;;  %v449_v61 = vld [vmem:[%s5626_s1 + $0x128] sm:$0xff]  ;;  %v444_v62 = vld [vmem:[%s5626_s1 + $0x100] sm:$0xff]  ;;  %v474_v30 = vld [vmem:[%s5626_s1 + $0x1f0] sm:$0xff] }
  0x34   :  { %338 = vperm.xlu1 %3705, %v311_v48   ;;  %335 = vperm.xlu0 %3704, %v310_v55   ;;  %v2922_v58 = vpack.c.bf16 %v449_v61, %v445_v50  ;;  %v453_v63 = vld [vmem:[%s5626_s1 + $0x148] sm:$0xff]  ;;  %v540_v54 = vld [vmem:[%s5626_s1 + $0x400] sm:$0xff]  ;;  %v490_v26 = vld [vmem:[%s5626_s1 + $0x270] sm:$0xff] }
  0x35   :  { %v457_v52 = vld [vmem:[%s5626_s1 + $0x168] sm:$0xff]  ;;  %v544_v59 = vld [vmem:[%s5626_s1 + $0x420] sm:$0xff]  ;;  %v499_v37 = vld [vmem:[%s5626_s1 + $0x2b8] sm:$0xff] }
  0x36   :  { %2917 = vmatpush1.bf16.msra.mxu0 %v2916_v57  ;;  %v541_v48 = vld [vmem:[%s5626_s1 + $0x408] sm:$0xff]  ;;  %v2924_v57 = vpack.c.bf16 %v448_v56, %v444_v62  ;;  %v2926_v50 = vpack.c.bf16 %v457_v52, %v453_v63  ;;  %v452_v61 = vld [vmem:[%s5626_s1 + $0x140] sm:$0xff]  ;;  %v2972_v62 = vpack.c.bf16 %v544_v59, %v540_v54  ;;  %v507_v33 = vld [vmem:[%s5626_s1 + $0x2f8] sm:$0xff] }
  0x37   :  { %2919 = vmatprep.subr.bf16.mxu0 %v2918_v60  ;;  %v545_v55 = vld [vmem:[%s5626_s1 + $0x428] sm:$0xff]  ;;  %v552_v54 = vld [vmem:[%s5626_s1 + $0x460] sm:$0xff] }
  0x38   :  { %v2970_v60 = vpack.c.bf16 %v545_v55, %v541_v48  ;;  %v549_v56 = vld [vmem:[%s5626_s1 + $0x448] sm:$0xff]  ;;  %v548_v55 = vld [vmem:[%s5626_s1 + $0x440] sm:$0xff] }
  0x39   :  { %v461_v48 = vld [vmem:[%s5626_s1 + $0x188] sm:$0xff]  ;;  %v2976_v46 = vpack.c.bf16 %v552_v54, %v548_v55  ;;  %v564_v42 = vld [vmem:[%s5626_s1 + $0x4c0] sm:$0xff] }
  0x3a   :  { %2921 = vmatpush1.bf16.msra.mxu0 %v2920_v51  ;;  %v456_v51 = vld [vmem:[%s5626_s1 + $0x160] sm:$0xff]  ;;  %2971 = vmatprep.subr.bf16.mxu1 %v2970_v60  ;;  %v553_v63 = vld [vmem:[%s5626_s1 + $0x468] sm:$0xff] }
  0x3b   :  { %2923 = vmatprep.subr.bf16.mxu0 %v2922_v58  ;;  %v465_v58 = vld [vmem:[%s5626_s1 + $0x1a8] sm:$0xff]  ;;  %2973 = vmatpush1.bf16.msra.mxu1 %v2972_v62  ;;  %v2974_v52 = vpack.c.bf16 %v553_v63, %v549_v56  ;;  %v2928_v59 = vpack.c.bf16 %v456_v51, %v452_v61  ;;  %v460_v63 = vld [vmem:[%s5626_s1 + $0x180] sm:$0xff] }
  0x3c   :  { %v557_v60 = vld [vmem:[%s5626_s1 + $0x488] sm:$0xff]  ;;  %v2930_v56 = vpack.c.bf16 %v465_v58, %v461_v48  ;;  %v556_v51 = vld [vmem:[%s5626_s1 + $0x480] sm:$0xff] }
  0x3d   :  { %v561_v62 = vld [vmem:[%s5626_s1 + $0x4a8] sm:$0xff]  ;;  %2975 = vmatprep.subr.bf16.mxu1 %v2974_v52  ;;  %v560_v48 = vld [vmem:[%s5626_s1 + $0x4a0] sm:$0xff] }
  0x3e   :  { %2925 = vmatpush1.bf16.msra.mxu0 %v2924_v57  ;;  %v464_v57 = vld [vmem:[%s5626_s1 + $0x1a0] sm:$0xff]  ;;  %v2978_v61 = vpack.c.bf16 %v561_v62, %v557_v60  ;;  %v469_v55 = vld [vmem:[%s5626_s1 + $0x1c8] sm:$0xff]  ;;  %v2980_v58 = vpack.c.bf16 %v560_v48, %v556_v51 }
  0x3f   :  { %2927 = vmatprep.subr.bf16.mxu0 %v2926_v50  ;;  %v473_v50 = vld [vmem:[%s5626_s1 + $0x1e8] sm:$0xff]  ;;  %2977 = vmatpush1.bf16.msra.mxu1 %v2976_v46  ;;  %v2932_v60 = vpack.c.bf16 %v464_v57, %v460_v63  ;;  %v568_v46 = vld [vmem:[%s5626_s1 + $0x4e0] sm:$0xff]  ;;  %v415_v63 = vld [vmem:[%s5626_s1 + $0x18] sm:$0xff] }
  0x40   :  { %v565_v52 = vld [vmem:[%s5626_s1 + $0x4c8] sm:$0xff]  ;;  %2979 = vmatprep.subr.bf16.mxu1 %v2978_v61  ;;  %v2934_v51 = vpack.c.bf16 %v473_v50, %v469_v55  ;;  %v468_v48 = vld [vmem:[%s5626_s1 + $0x1c0] sm:$0xff]  ;;  %v419_v61 = vld [vmem:[%s5626_s1 + $0x38] sm:$0xff]  ;;  %v2984_v55 = vpack.c.bf16 %v568_v46, %v564_v42 }
  0x41   :  { %v569_v54 = vld [vmem:[%s5626_s1 + $0x4e8] sm:$0xff]  ;;  %v476_v53 = vld [vmem:[%s5626_s1 + $0x200] sm:$0xff] }
  0x42   :  { %2929 = vmatpush1.bf16.msra.mxu0 %v2928_v59  ;;  %v2982_v62 = vpack.c.bf16 %v569_v54, %v565_v52  ;;  %v472_v59 = vld [vmem:[%s5626_s1 + $0x1e0] sm:$0xff]  ;;  %v477_v57 = vld [vmem:[%s5626_s1 + $0x208] sm:$0xff]  ;;  %v2986_v52 = vpack.c.bf16 %v419_v61, %v415_v63 }
  0x43   :  { %2931 = vmatprep.subr.bf16.mxu0 %v2930_v56  ;;  %v481_v56 = vld [vmem:[%s5626_s1 + $0x228] sm:$0xff]  ;;  %2981 = vmatpush1.bf16.msra.mxu1 %v2980_v58  ;;  %v2936_v50 = vpack.c.bf16 %v472_v59, %v468_v48  ;;  %v480_v49 = vld [vmem:[%s5626_s1 + $0x220] sm:$0xff] }
  0x44   :  { %2983 = vmatprep.subr.bf16.mxu1 %v2982_v62  ;;  %v2938_v54 = vpack.c.bf16 %v481_v56, %v477_v57  ;;  %v485_v44 = vld [vmem:[%s5626_s1 + $0x248] sm:$0xff]  ;;  %v2940_v58 = vpack.c.bf16 %v480_v49, %v476_v53  ;;  %v484_v62 = vld [vmem:[%s5626_s1 + $0x240] sm:$0xff] }
  0x45   :  { %v489_v42 = vld [vmem:[%s5626_s1 + $0x268] sm:$0xff]  ;;  %v488_v46 = vld [vmem:[%s5626_s1 + $0x260] sm:$0xff] }
  0x46   :  { %2933 = vmatpush1.bf16.msra.mxu0 %v2932_v60  ;;  %v2942_v60 = vpack.c.bf16 %v489_v42, %v485_v44  ;;  %v497_v48 = vld [vmem:[%s5626_s1 + $0x2a8] sm:$0xff]  ;;  %v2944_v49 = vpack.c.bf16 %v488_v46, %v484_v62  ;;  %v492_v53 = vld [vmem:[%s5626_s1 + $0x280] sm:$0xff] }
  0x47   :  { %2935 = vmatprep.subr.bf16.mxu0 %v2934_v51  ;;  %2985 = vmatpush1.bf16.msra.mxu1 %v2984_v55  ;;  %v493_v51 = vld [vmem:[%s5626_s1 + $0x288] sm:$0xff]  ;;  %v496_v59 = vld [vmem:[%s5626_s1 + $0x2a0] sm:$0xff] }
  0x48   :  { %2987 = vmatprep.subr.bf16.mxu1 %v2986_v52  ;;  %v2946_v44 = vpack.c.bf16 %v497_v48, %v493_v51  ;;  %v501_v63 = vld [vmem:[%s5626_s1 + $0x2c8] sm:$0xff]  ;;  %v2948_v56 = vpack.c.bf16 %v496_v59, %v492_v53  ;;  %v500_v55 = vld [vmem:[%s5626_s1 + $0x2c0] sm:$0xff] }
  0x49   :  { %v505_v57 = vld [vmem:[%s5626_s1 + $0x2e8] sm:$0xff]  ;;  %v512_v62 = vld [vmem:[%s5626_s1 + $0x320] sm:$0xff] }
  0x4a   :  { %2937 = vmatpush1.bf16.msra.mxu0 %v2936_v50  ;;  %v2950_v61 = vpack.c.bf16 %v505_v57, %v501_v63  ;;  %v504_v50 = vld [vmem:[%s5626_s1 + $0x2e0] sm:$0xff]  ;;  %v509_v52 = vld [vmem:[%s5626_s1 + $0x308] sm:$0xff] }
  0x4b   :  { %2939 = vmatprep.subr.bf16.mxu0 %v2938_v54  ;;  %v513_v54 = vld [vmem:[%s5626_s1 + $0x328] sm:$0xff]  ;;  %v2952_v42 = vpack.c.bf16 %v504_v50, %v500_v55  ;;  %v520_v53 = vld [vmem:[%s5626_s1 + $0x360] sm:$0xff] }
  0x4c   :  { %v517_v46 = vld [vmem:[%s5626_s1 + $0x348] sm:$0xff]  ;;  %v528_v55 = vld [vmem:[%s5626_s1 + $0x3a0] sm:$0xff] }
  0x4d   :  { %v521_v51 = vld [vmem:[%s5626_s1 + $0x368] sm:$0xff] }
  0x4e   :  { %2941 = vmatpush1.bf16.msra.mxu0 %v2940_v58  ;;  %v2954_v58 = vpack.c.bf16 %v513_v54, %v509_v52  ;;  %v525_v59 = vld [vmem:[%s5626_s1 + $0x388] sm:$0xff] }
  0x4f   :  { %2943 = vmatprep.subr.bf16.mxu0 %v2942_v60  ;;  %v508_v60 = vld [vmem:[%s5626_s1 + $0x300] sm:$0xff]  ;;  %v529_v63 = vld [vmem:[%s5626_s1 + $0x3a8] sm:$0xff] }
  0x50   :  { %v2956_v48 = vpack.c.bf16 %v512_v62, %v508_v60  ;;  %v533_v50 = vld [vmem:[%s5626_s1 + $0x3c8] sm:$0xff]  ;;  %v536_v60 = vld [vmem:[%s5626_s1 + $0x3e0] sm:$0xff] }
  0x51   :  { %v537_v52 = vld [vmem:[%s5626_s1 + $0x3e8] sm:$0xff] }
  0x52   :  { %2945 = vmatpush1.bf16.msra.mxu0 %v2944_v49  ;;  %v2958_v49 = vpack.c.bf16 %v521_v51, %v517_v46  ;;  %v312_v46 = vlaneseq }
  0x53   :  { %2947 = vmatprep.subr.bf16.mxu0 %v2946_v44  ;;  %v516_v44 = vld [vmem:[%s5626_s1 + $0x340] sm:$0xff] }
  0x54   :  { %v2960_v57 = vpack.c.bf16 %v520_v53, %v516_v44  ;;  %v4579_v51 = vand.u32 127, %v312_v46  ;;  %v418_v53 = vld [vmem:[%s5626_s1 + $0x30] sm:$0xff] }
  0x56   :  { %2949 = vmatpush1.bf16.msra.mxu0 %v2948_v56  ;;  %v2962_v56 = vpack.c.bf16 %v529_v63, %v525_v59  ;;  %v4588_v44 = vadd.s32 128, %v4579_v51  ;;  %v423_v59 = vld [vmem:[%s5626_s1 + $0x58] sm:$0xff] }
  0x57   :  { %2951 = vmatprep.subr.bf16.mxu0 %v2950_v61  ;;  %v524_v61 = vld [vmem:[%s5626_s1 + $0x380] sm:$0xff]  ;;  %v427_v63 = vld [vmem:[%s5626_s1 + $0x78] sm:$0xff] }
  0x58   :  { %v2964_v54 = vpack.c.bf16 %v528_v55, %v524_v61  ;;  %v2990_v61 = vpack.c.bf16 %v427_v63, %v423_v59  ;;  %v422_v55 = vld [vmem:[%s5626_s1 + $0x50] sm:$0xff] }
  0x5a   :  { %2953 = vmatpush1.bf16.msra.mxu0 %v2952_v42  ;;  %v2966_v42 = vpack.c.bf16 %v537_v52, %v533_v50  ;;  %v426_v50 = vld [vmem:[%s5626_s1 + $0x70] sm:$0xff]  ;;  %v431_v52 = vld [vmem:[%s5626_s1 + $0x98] sm:$0xff] }
  0x5b   :  { %2955 = vmatprep.subr.bf16.mxu0 %v2954_v58  ;;  %v532_v58 = vld [vmem:[%s5626_s1 + $0x3c0] sm:$0xff]  ;;  %v2992_v63 = vpack.c.bf16 %v426_v50, %v422_v55  ;;  %v434_v55 = vld [vmem:[%s5626_s1 + $0xb0] sm:$0xff] }
  0x5c   :  { %v2968_v62 = vpack.c.bf16 %v536_v60, %v532_v58  ;;  %v5634_v58 = vmov 1.0   ;;  %v5690_v60 = vmov 0.0   ;;  %v4667_v50 = vld [vmem:[%s5627_s2] sm:$0xf] }
  0x5e   :  { %2957 = vmatpush1.bf16.msra.mxu0 %v2956_v48  ;;  %v414_v48 = vld [vmem:[%s5626_s1 + $0x10] sm:$0xff] }
  0x5f   :  { %2959 = vmatprep.subr.bf16.mxu0 %v2958_v49  ;;  %v4585_v49 = vadd.s32 256, %v4579_v51 }
  0x62   :  { %2961 = vmatpush1.bf16.msra.mxu0 %v2960_v57 }
  0x63   :  { %2963 = vmatprep.subr.bf16.mxu0 %v2962_v56  ;;  %v2988_v56 = vpack.c.bf16 %v418_v53, %v414_v48 }
  0x66   :  { %2965 = vmatpush1.bf16.msra.mxu0 %v2964_v54  ;;  %v435_v54 = vld [vmem:[%s5626_s1 + $0xb8] sm:$0xff] }
  0x67   :  { %2967 = vmatprep.subr.bf16.mxu0 %v2966_v42  ;;  %v4619_v42 = vshrl.u32 %v312_v46, 7  ;;  %v2994_v40 = vpack.c.bf16 %v435_v54, %v431_v52  ;;  %v439_v52 = vld [vmem:[%s5626_s1 + $0xd8] sm:$0xff] }
  0x68   :  { %v443_v54 = vld [vmem:[%s5626_s1 + $0xf8] sm:$0xff] }
  0x69   :  { %v584_v46 = vsub.s32 2, %v4619_v42  ;;  %v588_v53 = vsub.s32 3, %v4619_v42 }
  0x6a   :  { %2969 = vmatpush1.bf16.msra.mxu0 %v2968_v62 }
  0x6b   :  { %v4682_v47 = vrot.slane %v4667_v50, %v584_v46  ;;  %v4685_v43 = vrot.slane %v4667_v50, %v588_v53  ;;  %v438_v53 = vld [vmem:[%s5626_s1 + $0xd0] sm:$0xff] }
  0x6d   :  { %5691 = vst [vmem:[#allocation66_spill] sm:$0xff] %v4682_v47  ;;  %5692 = vst [vmem:[#allocation67_spill] sm:$0xff] %v4685_v43  ;;  %v2998_v43 = vpack.c.bf16 %v443_v54, %v439_v52  ;;  %v447_v47 = vld [vmem:[%s5626_s1 + $0x118] sm:$0xff] }
  0xa7   :  { %v4599_v57 = vpop.permute.xlu0 %317  ;;  %v4628_v48 = vpop.permute.xlu1 %323 }
  0xa8   :  { %vm342_vm1 = vcmp.eq.s32.totalorder %v4599_v57, %v4585_v49  ;;  %vm341_vm2 = vcmp.eq.s32.totalorder %v4599_v57, %v4588_v44  ;;  %vm340_vm3 = vcmp.eq.s32.totalorder %v4599_v57, %v4579_v51  ;;  %vm348_vm4 = vcmp.eq.s32.totalorder %v4628_v48, %v4585_v49  ;;  %v567_v57 = vld [vmem:[%s5626_s1 + $0x4d8] sm:$0xff] }
  0xa9   :  { %2778 = vmatprep.mubr.msk.f32.mxu0 %vm341_vm2, %v5634_v58  ;;  %v4626_v62 = vsel %vm342_vm1, 1.0, %v5690_v60  ;;  %vm347_vm8 = vcmp.eq.s32.totalorder %v4628_v48, %v4588_v44  ;;  %vm346_vm9 = vcmp.eq.s32.totalorder %v4628_v48, %v4579_v51  ;;  %v4697_v38 = vsel %vm348_vm4, 1.0, %v5690_v60 }
  0xaa   :  { %2779 = vmatmul.mubr.msk.f32.vlgmr.msra.gmra.mrb[0].mxu0 %vm340_vm3, %v5634_v58  ;;  %2794 = vmatmul.mubr.msk.f32.vlgmr.msra.gmra.mrb[0].mxu1 %vm594_vm0, %v4626_v62 }
  0xab   :  { %2989 = vmatpush1.bf16.msra.mxu1 %v2988_v56  ;;  %v4640_v59 = vpop.permute.xlu0 %320  ;;  %802 = vmatprep.mubr.f32.mxu1 %v5690_v60  ;;  %v430_v56 = vld [vmem:[%s5626_s1 + $0x90] sm:$0xff] }
  0xac   :  { %vm345_vm5 = vcmp.eq.s32.totalorder %v4640_v59, %v4585_v49  ;;  %vm344_vm6 = vcmp.eq.s32.totalorder %v4640_v59, %v4588_v44  ;;  %2991 = vmatprep.subr.bf16.mxu1 %v2990_v61  ;;  %vm343_vm7 = vcmp.eq.s32.totalorder %v4640_v59, %v4579_v51  ;;  %v2996_v46 = vpack.c.bf16 %v434_v55, %v430_v56  ;;  %v451_v56 = vld [vmem:[%s5626_s1 + $0x138] sm:$0xff] }
  0xad   :  { %2780 = vmatprep.mubr.msk.f32.mxu0 %vm344_vm6, %v5634_v58  ;;  %v4662_v61 = vsel %vm345_vm5, 1.0, %v5690_v60  ;;  %v3002_v54 = vpack.c.bf16 %v451_v56, %v447_v47  ;;  %v459_v47 = vld [vmem:[%s5626_s1 + $0x178] sm:$0xff] }
  0xae   :  { %2781 = vmatmul.mubr.msk.f32.gmra.mrb[2].mxu0 %vm343_vm7, %v5634_v58  ;;  %2795 = vmatmul.mubr.msk.f32.gmra.mrb[2].mxu1 %vm594_vm0, %v4662_v61 }
  0xaf   :  { %2993 = vmatpush1.bf16.msra.mxu1 %v2992_v63  ;;  %2782 = vmatprep.mubr.msk.f32.mxu0 %vm347_vm8, %v5634_v58  ;;  %v442_v63 = vld [vmem:[%s5626_s1 + $0xf0] sm:$0xff]  ;;  %v4706_v58 = vpop.permute.xlu1 %326  ;;  %v4724_v55 = vpop.permute.xlu0 %329 }
  0xb0   :  { %808 = vmatprep.mubr.f32.mxu1 %v5690_v60  ;;  %2995 = vmatprep.subr.bf16.mxu1 %v2994_v40  ;;  %vm351_vm10 = vcmp.eq.s32.totalorder %v4706_v58, %v4585_v49  ;;  %v5693_v40 = vmov 1.0   ;;  %vm350_vm11 = vcmp.eq.s32.totalorder %v4706_v58, %v4588_v44  ;;  %v3000_v52 = vpack.c.bf16 %v442_v63, %v438_v53  ;;  %v455_v53 = vld [vmem:[%s5626_s1 + $0x158] sm:$0xff] }
  0xb1   :  { %vm349_vm12 = vcmp.eq.s32.totalorder %v4706_v58, %v4579_v51  ;;  %vm354_vm13 = vcmp.eq.s32.totalorder %v4724_v55, %v4585_v49  ;;  %vm353_vm14 = vcmp.eq.s32.totalorder %v4724_v55, %v4588_v44  ;;  %v3004_v63 = vpack.c.bf16 %v450_v45, %v446_v34  ;;  %v463_v34 = vld [vmem:[%s5626_s1 + $0x198] sm:$0xff] }
  0xb2   :  { %2783 = vmatmul.mubr.msk.f32.gmra.mrb[4].mxu0 %vm346_vm9, %v5693_v40  ;;  %2796 = vmatmul.mubr.msk.f32.gmra.mrb[4].mxu1 %vm594_vm0, %v4697_v38  ;;  %v3006_v56 = vpack.c.bf16 %v459_v47, %v455_v53  ;;  %vm352_vm15 = vcmp.eq.s32.totalorder %v4724_v55, %v4579_v51  ;;  %v467_v45 = vld [vmem:[%s5626_s1 + $0x1b8] sm:$0xff]  ;;  %v3008_v53 = vpack.c.bf16 %v458_v36, %v454_v41 }
  0xb3   :  { %2997 = vmatpush1.bf16.msra.mxu1 %v2996_v46  ;;  %2784 = vmatprep.mubr.msk.f32.mxu0 %vm350_vm11, %v5693_v40  ;;  %v4740_v46 = vsel %vm351_vm10, 1.0, %v5690_v60  ;;  %v3010_v47 = vpack.c.bf16 %v467_v45, %v463_v34  ;;  %v471_v36 = vld [vmem:[%s5626_s1 + $0x1d8] sm:$0xff]  ;;  %v3012_v34 = vpack.c.bf16 %v466_v39, %v462_v32 }
  0xb4   :  { %814 = vmatprep.mubr.f32.mxu1 %v5690_v60  ;;  %2999 = vmatprep.subr.bf16.mxu1 %v2998_v43  ;;  %v4758_v43 = vpop.permute.xlu1 %332  ;;  %v475_v41 = vld [vmem:[%s5626_s1 + $0x1f8] sm:$0xff] }
  0xb5   :  { %vm357_vm1 = vcmp.eq.s32.totalorder %v4758_v43, %v4585_v49  ;;  %vm356_vm4 = vcmp.eq.s32.totalorder %v4758_v43, %v4588_v44  ;;  %vm5639_vm5 = vcmp.eq.s32.totalorder %v4758_v43, %v4579_v51  ;;  %v3014_v45 = vpack.c.bf16 %v475_v41, %v471_v36  ;;  %v479_v32 = vld [vmem:[%s5626_s1 + $0x218] sm:$0xff]  ;;  %v482_v41 = vld [vmem:[%s5626_s1 + $0x230] sm:$0xff] }
  0xb6   :  { %2785 = vmatmul.mubr.msk.f32.gmra.mrb[6].mxu0 %vm349_vm12, %v5693_v40  ;;  %2797 = vmatmul.mubr.msk.f32.gmra.mrb[6].mxu1 %vm594_vm0, %v4740_v46  ;;  %v483_v39 = vld [vmem:[%s5626_s1 + $0x238] sm:$0xff] }
  0xb7   :  { %3001 = vmatpush1.bf16.msra.mxu1 %v3000_v52  ;;  %2786 = vmatprep.mubr.msk.f32.mxu0 %vm353_vm14, %v5693_v40  ;;  %v4774_v52 = vsel %vm354_vm13, 1.0, %v5690_v60  ;;  %v3018_v36 = vpack.c.bf16 %v483_v39, %v479_v32  ;;  %v486_v39 = vld [vmem:[%s5626_s1 + $0x250] sm:$0xff] }
  0xb8   :  { %820 = vmatprep.mubr.f32.mxu1 %v5690_v60  ;;  %3003 = vmatprep.subr.bf16.mxu1 %v3002_v54  ;;  %v4792_v54 = vpop.permute.xlu0 %335 }
  0xb9   :  { %vm5638_vm10 = vcmp.eq.s32.totalorder %v4792_v54, %v4588_v44  ;;  %vm360_vm13 = vcmp.eq.s32.totalorder %v4792_v54, %v4585_v49 }
  0xba   :  { %2787 = vmatmul.mubr.msk.f32.gmra.mrb[8].mxu0 %vm352_vm15, %v5693_v40  ;;  %2798 = vmatmul.mubr.msk.f32.gmra.mrb[8].mxu1 %vm594_vm0, %v4774_v52 }
  0xbb   :  { %3005 = vmatpush1.bf16.msra.mxu1 %v3004_v63  ;;  %2788 = vmatprep.mubr.msk.f32.mxu0 %vm356_vm4, %v5693_v40  ;;  %v4808_v63 = vsel %vm357_vm1, 1.0, %v5690_v60  ;;  %vm358_vm1 = vcmp.eq.s32.totalorder %v4792_v54, %v4579_v51 }
  0xbc   :  { %826 = vmatprep.mubr.f32.mxu1 %v5690_v60  ;;  %3007 = vmatprep.subr.bf16.mxu1 %v3006_v56  ;;  %v4826_v56 = vpop.permute.xlu1 %338 }
  0xbe   :  { %2789 = vmatmul.mubr.msk.f32.gmra.mrb[10].mxu0 %vm5639_vm5, %v5693_v40  ;;  %2799 = vmatmul.mubr.msk.f32.gmra.mrb[10].mxu1 %vm594_vm0, %v4808_v63  ;;  %vm363_vm5 = vcmp.eq.s32.totalorder %v4826_v56, %v4585_v49  ;;  %v478_v49 = vld [vmem:[%s5626_s1 + $0x210] sm:$0xff] }
  0xbf   :  { %3009 = vmatpush1.bf16.msra.mxu1 %v3008_v53  ;;  %2790 = vmatprep.mubr.msk.f32.mxu0 %vm5638_vm10, %v5693_v40  ;;  %v4842_v53 = vsel %vm360_vm13, 1.0, %v5690_v60  ;;  %vm362_vm10 = vcmp.eq.s32.totalorder %v4826_v56, %v4588_v44  ;;  %vm361_vm13 = vcmp.eq.s32.totalorder %v4826_v56, %v4579_v51 }
  0xc0   :  { %832 = vmatprep.mubr.f32.mxu1 %v5690_v60  ;;  %3011 = vmatprep.subr.bf16.mxu1 %v3010_v47  ;;  %v3016_v47 = vpack.c.bf16 %v474_v30, %v470_v35  ;;  %v487_v30 = vld [vmem:[%s5626_s1 + $0x258] sm:$0xff] }
  0xc1   :  { %v491_v35 = vld [vmem:[%s5626_s1 + $0x278] sm:$0xff] }
  0xc2   :  { %2791 = vmatmul.mubr.msk.f32.gmra.mrb[12].mxu0 %vm358_vm1, %v5693_v40  ;;  %2800 = vmatmul.mubr.msk.f32.gmra.mrb[12].mxu1 %vm594_vm0, %v4842_v53  ;;  %v3022_v32 = vpack.c.bf16 %v491_v35, %v487_v30  ;;  %v498_v30 = vld [vmem:[%s5626_s1 + $0x2b0] sm:$0xff]  ;;  %v503_v35 = vld [vmem:[%s5626_s1 + $0x2d8] sm:$0xff] }
  0xc3   :  { %3013 = vmatpush1.bf16.msra.mxu1 %v3012_v34  ;;  %2792 = vmatprep.mubr.msk.f32.mxu0 %vm362_vm10, %v5693_v40  ;;  %v4874_v34 = vsel %vm363_vm5, 1.0, %v5690_v60 }
  0xc4   :  { %838 = vmatprep.mubr.f32.mxu1 %v5690_v60  ;;  %3015 = vmatprep.subr.bf16.mxu1 %v3014_v45  ;;  %v3020_v45 = vpack.c.bf16 %v482_v41, %v478_v49  ;;  %v3024_v49 = vpack.c.bf16 %v490_v26, %v486_v39  ;;  %v494_v41 = vld [vmem:[%s5626_s1 + $0x290] sm:$0xff]  ;;  %v511_v39 = vld [vmem:[%s5626_s1 + $0x318] sm:$0xff] }
  0xc5   :  { %v3028_v26 = vpack.c.bf16 %v498_v30, %v494_v41  ;;  %v514_v41 = vld [vmem:[%s5626_s1 + $0x330] sm:$0xff]  ;;  %v519_v30 = vld [vmem:[%s5626_s1 + $0x358] sm:$0xff] }
  0xc6   :  { %2793 = vmatmul.mubr.msk.f32.gmra.mrb[14].mxu0 %vm361_vm13, %v5693_v40  ;;  %2801 = vmatmul.mubr.msk.f32.gmra.mrb[14].mxu1 %vm594_vm0, %v4874_v34 }
  0xc7   :  { %3017 = vmatpush1.bf16.msra.mxu1 %v3016_v47  ;;  %2802 = vmatprep.mubr.msk.f32.mxu1 %vm341_vm2, %v5693_v40  ;;  %v495_v47 = vld [vmem:[%s5626_s1 + $0x298] sm:$0xff]  ;;  %vm5694_vm2 = vcmp.eq.s32.totalorder %v4758_v43, %v4579_v51  ;;  %v580_v51 = vsub.s32 1, %v4619_v42 }
  0xc8   :  { %3019 = vmatprep.subr.bf16.mxu1 %v3018_v36  ;;  %v3026_v36 = vpack.c.bf16 %v499_v37, %v495_v47  ;;  %v3030_v37 = vpack.c.bf16 %v507_v33, %v503_v35  ;;  %v515_v47 = vld [vmem:[%s5626_s1 + $0x338] sm:$0xff]  ;;  %1242 = vmatprep.mubr.f32.mxu0 %v5690_v60 }
  0xc9   :  { %v3034_v33 = vpack.c.bf16 %v515_v47, %v511_v39  ;;  %v523_v35 = vld [vmem:[%s5626_s1 + $0x378] sm:$0xff]  ;;  %v581_v58 = vrot.slane %v4667_v50, %v580_v51 }
  0xca   :  { %v527_v39 = vld [vmem:[%s5626_s1 + $0x398] sm:$0xff] }
  0xcb   :  { %3021 = vmatpush1.bf16.msra.mxu1 %v3020_v45  ;;  %v502_v45 = vld [vmem:[%s5626_s1 + $0x2d0] sm:$0xff]  ;;  %v531_v47 = vld [vmem:[%s5626_s1 + $0x3b8] sm:$0xff] }
  0xcc   :  { %3023 = vmatprep.subr.bf16.mxu1 %v3022_v32  ;;  %v506_v32 = vld [vmem:[%s5626_s1 + $0x2f0] sm:$0xff] }
  0xcf   :  { %3025 = vmatpush1.bf16.msra.mxu1 %v3024_v49  ;;  %v3032_v49 = vpack.c.bf16 %v506_v32, %v502_v45  ;;  %v518_v45 = vld [vmem:[%s5626_s1 + $0x350] sm:$0xff] }
  0xd0   :  { %3027 = vmatprep.subr.bf16.mxu1 %v3026_v36  ;;  %v510_v36 = vld [vmem:[%s5626_s1 + $0x310] sm:$0xff] }
  0xd1   :  { %v522_v32 = vld [vmem:[%s5626_s1 + $0x370] sm:$0xff] }
  0xd3   :  { %3029 = vmatpush1.bf16.msra.mxu1 %v3028_v26  ;;  %v3036_v26 = vpack.c.bf16 %v514_v41, %v510_v36  ;;  %v526_v36 = vld [vmem:[%s5626_s1 + $0x390] sm:$0xff] }
  0xd4   :  { %3031 = vmatprep.subr.bf16.mxu1 %v3030_v37  ;;  %v3038_v37 = vpack.c.bf16 %v523_v35, %v519_v30  ;;  %v530_v41 = vld [vmem:[%s5626_s1 + $0x3b0] sm:$0xff]  ;;  %v535_v30 = vld [vmem:[%s5626_s1 + $0x3d8] sm:$0xff] }
  0xd5   :  { %v539_v35 = vld [vmem:[%s5626_s1 + $0x3f8] sm:$0xff] }
  0xd7   :  { %3033 = vmatpush1.bf16.msra.mxu1 %v3032_v49  ;;  %v3040_v49 = vpack.c.bf16 %v522_v32, %v518_v45  ;;  %v534_v45 = vld [vmem:[%s5626_s1 + $0x3d0] sm:$0xff] }
  0xd8   :  { %3035 = vmatprep.subr.bf16.mxu1 %v3034_v33  ;;  %v3042_v33 = vpack.c.bf16 %v531_v47, %v527_v39  ;;  %v538_v32 = vld [vmem:[%s5626_s1 + $0x3f0] sm:$0xff]  ;;  %v543_v39 = vld [vmem:[%s5626_s1 + $0x418] sm:$0xff] }
  0xd9   :  { %v547_v47 = vld [vmem:[%s5626_s1 + $0x438] sm:$0xff] }
  0xdb   :  { %3037 = vmatpush1.bf16.msra.mxu1 %v3036_v26  ;;  %v3044_v26 = vpack.c.bf16 %v530_v41, %v526_v36  ;;  %v542_v36 = vld [vmem:[%s5626_s1 + $0x410] sm:$0xff] }
  0xdc   :  { %3039 = vmatprep.subr.bf16.mxu1 %v3038_v37  ;;  %v3046_v37 = vpack.c.bf16 %v539_v35, %v535_v30  ;;  %v546_v41 = vld [vmem:[%s5626_s1 + $0x430] sm:$0xff]  ;;  %v551_v30 = vld [vmem:[%s5626_s1 + $0x458] sm:$0xff] }
  0xdd   :  { %v555_v35 = vld [vmem:[%s5626_s1 + $0x478] sm:$0xff] }
  0xdf   :  { %3041 = vmatpush1.bf16.msra.mxu1 %v3040_v49  ;;  %v3048_v49 = vpack.c.bf16 %v538_v32, %v534_v45  ;;  %v550_v45 = vld [vmem:[%s5626_s1 + $0x450] sm:$0xff] }
  0xe0   :  { %3043 = vmatprep.subr.bf16.mxu1 %v3042_v33  ;;  %v3050_v33 = vpack.c.bf16 %v547_v47, %v543_v39  ;;  %v554_v32 = vld [vmem:[%s5626_s1 + $0x470] sm:$0xff]  ;;  %v559_v39 = vld [vmem:[%s5626_s1 + $0x498] sm:$0xff] }
  0xe1   :  { %v563_v47 = vld [vmem:[%s5626_s1 + $0x4b8] sm:$0xff] }
  0xe3   :  { %3045 = vmatpush1.bf16.msra.mxu1 %v3044_v26  ;;  %v3052_v26 = vpack.c.bf16 %v546_v41, %v542_v36  ;;  %v558_v36 = vld [vmem:[%s5626_s1 + $0x490] sm:$0xff] }
  0xe4   :  { %3047 = vmatprep.subr.bf16.mxu1 %v3046_v37  ;;  %v3054_v37 = vpack.c.bf16 %v555_v35, %v551_v30  ;;  %v562_v41 = vld [vmem:[%s5626_s1 + $0x4b0] sm:$0xff]  ;;  %v571_v30 = vld [vmem:[%s5626_s1 + $0x4f8] sm:$0xff] }
  0xe5   :  { %v3060_v35 = vpack.c.bf16 %v562_v41, %v558_v36 }
  0xe7   :  { %3049 = vmatpush1.bf16.msra.mxu1 %v3048_v49  ;;  %v3056_v49 = vpack.c.bf16 %v554_v32, %v550_v45  ;;  %v570_v45 = vld [vmem:[%s5626_s1 + $0x4f0] sm:$0xff] }
  0xe8   :  { %3051 = vmatprep.subr.bf16.mxu1 %v3050_v33  ;;  %v3058_v33 = vpack.c.bf16 %v563_v47, %v559_v39 }
  0xea   :  { %2803 = vmatmul.mubr.msk.f32.vlgmr.msra.gmra.mrb[16].mxu1 %vm340_vm3, %v5693_v40  ;;  %vm5695_vm3 = vcmp.eq.s32.totalorder %v4792_v54, %v4588_v44 }
  0xeb   :  { %2804 = vmatprep.mubr.msk.f32.mxu1 %vm344_vm6, %v5693_v40  ;;  %3053 = vmatpush1.bf16.msra.mxu1 %v3052_v26  ;;  %v3062_v26 = vpack.c.bf16 %v571_v30, %v567_v57 }
  0xec   :  { %3055 = vmatprep.subr.bf16.mxu1 %v3054_v37  ;;  %v566_v37 = vld [vmem:[%s5626_s1 + $0x4d0] sm:$0xff] }
  0xed   :  { %v3064_v59 = vpack.c.bf16 %v570_v45, %v566_v37 }
  0xee   :  { %2805 = vmatmul.mubr.msk.f32.gmra.mrb[18].mxu1 %vm343_vm7, %v5693_v40 }
  0xef   :  { %2806 = vmatprep.mubr.msk.f32.mxu1 %vm347_vm8, %v5693_v40  ;;  %3057 = vmatpush1.bf16.msra.mxu1 %v3056_v49 }
  0xf0   :  { %3059 = vmatprep.subr.bf16.mxu1 %v3058_v33 }
  0xf2   :  { %2807 = vmatmul.mubr.msk.f32.gmra.mrb[20].mxu1 %vm346_vm9, %v5693_v40 }
  0xf3   :  { %2808 = vmatprep.mubr.msk.f32.mxu1 %vm350_vm11, %v5693_v40  ;;  %3061 = vmatpush1.bf16.msra.mxu1 %v3060_v35 }
  0xf4   :  { %3063 = vmatprep.subr.bf16.mxu1 %v3062_v26 }
  0xf6   :  { %2809 = vmatmul.mubr.msk.f32.gmra.mrb[22].mxu1 %vm349_vm12, %v5693_v40 }
  0xf7   :  { %2810 = vmatprep.mubr.msk.f32.mxu1 %vm353_vm14, %v5693_v40  ;;  %3065 = vmatpush1.bf16.msra.mxu1 %v3064_v59 }
  0xfa   :  { %2811 = vmatmul.mubr.msk.f32.gmra.mrb[24].mxu1 %vm352_vm15, %v5693_v40 }
  0xfb   :  { %2812 = vmatprep.mubr.msk.f32.mxu1 %vm356_vm4, %v5693_v40 }
  0xfe   :  { %2813 = vmatmul.mubr.msk.f32.gmra.mrb[26].mxu1 %vm5694_vm2, %v5693_v40 }
  0xff   :  { %2814 = vmatprep.mubr.msk.f32.mxu1 %vm5695_vm3, %v5693_v40 }
 0x102   :  { %2815 = vmatmul.mubr.msk.f32.gmra.mrb[28].mxu1 %vm358_vm1, %v5693_v40 }
 0x103   :  { %2816 = vmatprep.mubr.msk.f32.mxu1 %vm362_vm10, %v5693_v40 }
 0x106   :  { %2817 = vmatmul.mubr.msk.f32.gmra.mrb[30].mxu1 %vm361_vm13, %v5693_v40 }
 0x107   :  { %1022 = vmatprep.mubr.f32.mxu1 %v5690_v60 }
 0x10a   :  { %2818 = vmatmul.mubr.msk.f32.vlgmr.msra.gmra.mrb[16].mxu1 %vm594_vm0, %v4626_v62 }
 0x10b   :  { %1028 = vmatprep.mubr.f32.mxu1 %v5690_v60 }
 0x10e   :  { %2819 = vmatmul.mubr.msk.f32.gmra.mrb[18].mxu1 %vm594_vm0, %v4662_v61 }
 0x10f   :  { %1034 = vmatprep.mubr.f32.mxu1 %v5690_v60 }
 0x112   :  { %2820 = vmatmul.mubr.msk.f32.gmra.mrb[20].mxu1 %vm594_vm0, %v4697_v38  ;;  %v576_v38 = vsub.s32 0, %v4619_v42 }
 0x113   :  { %1040 = vmatprep.mubr.f32.mxu1 %v5690_v60 }
 0x114   :  { %v577_v44 = vrot.slane %v4667_v50, %v576_v38 }
 0x116   :  { %2821 = vmatmul.mubr.msk.f32.gmra.mrb[22].mxu1 %vm594_vm0, %v4740_v46 }
 0x117   :  { %1046 = vmatprep.mubr.f32.mxu1 %v5690_v60 }
 0x11a   :  { %2822 = vmatmul.mubr.msk.f32.gmra.mrb[24].mxu1 %vm594_vm0, %v4774_v52 }
 0x11b   :  { %1052 = vmatprep.mubr.f32.mxu1 %v5690_v60 }
 0x11e   :  { %2823 = vmatmul.mubr.msk.f32.gmra.mrb[26].mxu1 %vm594_vm0, %v4808_v63 }
 0x11f   :  { %1058 = vmatprep.mubr.f32.mxu1 %v5690_v60 }
 0x122   :  { %2824 = vmatmul.mubr.msk.f32.gmra.mrb[28].mxu1 %vm594_vm0, %v4842_v53 }
 0x123   :  { %1064 = vmatprep.mubr.f32.mxu1 %v5690_v60 }
 0x126   :  { %2825 = vmatmul.mubr.msk.f32.gmra.mrb[30].mxu1 %vm594_vm0, %v4874_v34 }
 0x17d   :  { %v685_v62 = vpop.f32.mrb[0].mxu0  ;;  %v798_v48 = vpop.f32.mrb[0].mxu1 }
 0x17e   :  { %v686_v61 = vadd.f32 %v685_v62, %v577_v44  ;;  %v687_v40 = vpop.f32.mrb[1].mxu0  ;;  %v800_v55 = vpop.f32.mrb[1].mxu1 }
 0x17f   :  { %v688_v46 = vadd.f32 %v687_v40, %v581_v58 }
 0x180   :  { %v5106_v43 = vadd.f32 %v798_v48, %v686_v61 }
 0x181   :  { %v5108_v52 = vadd.f32 %v800_v55, %v688_v46  ;;  %v691_v54 = vpop.f32.mrb[2].mxu0  ;;  %v804_v63 = vpop.f32.mrb[2].mxu1 }
 0x182   :  { %v692_v56 = vadd.f32 %v691_v54, %v577_v44  ;;  %v693_v53 = vpop.f32.mrb[3].mxu0  ;;  %v806_v34 = vpop.f32.mrb[3].mxu1 }
 0x183   :  { %v694_v42 = vadd.f32 %v693_v53, %v581_v58 }
 0x184   :  { %v5110_v32 = vadd.f32 %v804_v63, %v692_v56 }
 0x185   :  { %v5112_v39 = vadd.f32 %v806_v34, %v694_v42  ;;  %v697_v50 = vpop.f32.mrb[4].mxu0  ;;  %v810_v47 = vpop.f32.mrb[4].mxu1 }
 0x186   :  { %v698_v49 = vadd.f32 %v697_v50, %v577_v44  ;;  %v699_v33 = vpop.f32.mrb[5].mxu0  ;;  %v812_v36 = vpop.f32.mrb[5].mxu1 }
 0x187   :  { %v700_v41 = vadd.f32 %v699_v33, %v581_v58 }
 0x188   :  { %v5114_v57 = vadd.f32 %v810_v47, %v698_v49 }
 0x189   :  { %v5116_v30 = vadd.f32 %v812_v36, %v700_v41  ;;  %v703_v35 = vpop.f32.mrb[6].mxu0  ;;  %v816_v26 = vpop.f32.mrb[6].mxu1 }
 0x18a   :  { %v704_v37 = vadd.f32 %v703_v35, %v577_v44  ;;  %v705_v45 = vpop.f32.mrb[7].mxu0  ;;  %v818_v59 = vpop.f32.mrb[7].mxu1 }
 0x18b   :  { %v706_v38 = vadd.f32 %v705_v45, %v581_v58 }
 0x18c   :  { %v5118_v51 = vadd.f32 %v816_v26, %v704_v37 }
 0x18d   :  { %v5120_v62 = vadd.f32 %v818_v59, %v706_v38  ;;  %v709_v48 = vpop.f32.mrb[8].mxu0  ;;  %v822_v61 = vpop.f32.mrb[8].mxu1 }
 0x18e   :  { %v710_v40 = vadd.f32 %v709_v48, %v577_v44  ;;  %v711_v55 = vpop.f32.mrb[9].mxu0  ;;  %v824_v46 = vpop.f32.mrb[9].mxu1 }
 0x18f   :  { %v712_v54 = vadd.f32 %v711_v55, %v581_v58 }
 0x190   :  { %v5122_v63 = vadd.f32 %v822_v61, %v710_v40 }
 0x191   :  { %v5124_v56 = vadd.f32 %v824_v46, %v712_v54  ;;  %v715_v53 = vpop.f32.mrb[10].mxu0  ;;  %v828_v34 = vpop.f32.mrb[10].mxu1 }
 0x192   :  { %v716_v42 = vadd.f32 %v715_v53, %v577_v44  ;;  %v717_v50 = vpop.f32.mrb[11].mxu0  ;;  %v830_v47 = vpop.f32.mrb[11].mxu1 }
 0x193   :  { %v718_v49 = vadd.f32 %v717_v50, %v581_v58  ;;  %v5140_v50 = vpack.c.bf16 %v3933_v5, %v3913_v1 }
 0x194   :  { %v5126_v33 = vadd.f32 %v828_v34, %v716_v42 }
 0x195   :  { %v5128_v36 = vadd.f32 %v830_v47, %v718_v49  ;;  %v721_v41 = vpop.f32.mrb[12].mxu0  ;;  %v834_v35 = vpop.f32.mrb[12].mxu1  ;;  %v5144_v47 = vpack.c.bf16 %v3928_v4, %v3908_v0  ;;  %v5148_v49 = vpack.c.bf16 %v3973_v13, %v3953_v9 }
 0x196   :  { %v722_v26 = vadd.f32 %v721_v41, %v577_v44  ;;  %v723_v37 = vpop.f32.mrb[13].mxu0  ;;  %v836_v45 = vpop.f32.mrb[13].mxu1 }
 0x197   :  { %v724_v59 = vadd.f32 %v723_v37, %v581_v58 }
 0x198   :  { %v5130_v38 = vadd.f32 %v834_v35, %v722_v26 }
 0x199   :  { %v5132_v48 = vadd.f32 %v836_v45, %v724_v59  ;;  %v727_v61 = vpop.f32.mrb[14].mxu0  ;;  %v840_v40 = vpop.f32.mrb[14].mxu1 }
 0x19a   :  { %v728_v55 = vadd.f32 %v727_v61, %v577_v44  ;;  %v729_v46 = vpop.f32.mrb[15].mxu0  ;;  %v842_v54 = vpop.f32.mrb[15].mxu1 }
 0x19b   :  { %v730_v53 = vadd.f32 %v729_v46, %v581_v58 }
 0x19c   :  { %v5134_v34 = vadd.f32 %v840_v40, %v728_v55 }
 0x19d   :  { %v5136_v42 = vadd.f32 %v842_v54, %v730_v53 }
 0x19f   :  { %5696 = vst [vmem:[#allocation68_spill] sm:$0xff] %v5136_v42 }
 0x1a0   :  { %3856 = dma.done.wait [#allocation6], 8192 }
 0x1a1   :  { %3857 = vsyncadd [#allocation6], 4294959104  ;;  %1313 = vmatprep.mubr.f32.mxu1 %v5690_v60  ;;  %3067 = vmatprep.subr.bf16.mxu0 %v5140_v50  ;;  %v5155_v1 = vpack.c.bf16 %v3943_v7, %v3923_v3  ;;  %v5159_v0 = vpack.c.bf16 %v3938_v6, %v3918_v2  ;;  %v5164_v4 = vpack.c.bf16 %v3968_v12, %v3948_v8  ;;  %v5697_v12 = vld [vmem:[#allocation19_spill] sm:$0xff]  ;;  %v5709_v44 = vld [vmem:[#allocation29_spill] sm:$0xff] }
 0x1a2   :  { %3069 = vmatpush1.bf16.msra.mxu0 %v5144_v47  ;;  %v5168_v5 = vpack.c.bf16 %v3983_v15, %v3963_v11  ;;  %v5173_v3 = vpack.c.bf16 %v4013_v21, %v3993_v17  ;;  %v5179_v2 = vpack.c.bf16 %v3978_v14, %v3958_v10  ;;  %v5184_v6 = vpack.c.bf16 %v4023_v23, %v4003_v19  ;;  %v5698_v13 = vld [vmem:[#allocation23_spill] sm:$0xff]  ;;  %v5699_v15 = vld [vmem:[#allocation16_spill] sm:$0xff]  ;;  %v5702_v19 = vld [vmem:[#allocation25_spill] sm:$0xff] }
 0x1a3   :  { %3071 = vmatprep.subr.bf16.mxu0 %v5148_v49  ;;  %3099 = vmatprep.subr.bf16.mxu1 %v5155_v1  ;;  %v5189_v7 = vpack.c.bf16 %v4008_v20, %v3988_v16  ;;  %v5194_v8 = vpack.c.bf16 %v4053_v29, %v4033_v25  ;;  %v5199_v9 = vpack.c.bf16 %v4018_v22, %v3998_v18  ;;  %v5700_v16 = vld [vmem:[#allocation17_spill] sm:$0xff]  ;;  %v5703_v21 = vld [vmem:[#allocation18_spill] sm:$0xff]  ;;  %v5706_v25 = vld [vmem:[#allocation31_spill] sm:$0xff] }
 0x1a4   :  { %3101 = vmatpush1.bf16.msra.mxu1 %v5159_v0  ;;  %v5204_v10 = vpack.c.bf16 %v4063_v31, %v4043_v27  ;;  %v5209_v11 = vpack.c.bf16 %v4048_v28, %v4028_v24  ;;  %v5214_v14 = vpack.c.bf16 %v5698_v13, %v5697_v12  ;;  %v5219_v17 = vpack.c.bf16 %v5700_v16, %v5699_v15  ;;  %v5701_v18 = vld [vmem:[#allocation21_spill] sm:$0xff]  ;;  %v5704_v22 = vld [vmem:[#allocation22_spill] sm:$0xff]  ;;  %v5705_v24 = vld [vmem:[#allocation27_spill] sm:$0xff] }
 0x1a5   :  { %3103 = vmatprep.subr.bf16.mxu1 %v5168_v5  ;;  %v5224_v20 = vpack.c.bf16 %v5702_v19, %v5701_v18  ;;  %v5229_v23 = vpack.c.bf16 %v5704_v22, %v5703_v21  ;;  %v5234_v27 = vpack.c.bf16 %v5706_v25, %v5705_v24  ;;  %v5707_v28 = vld [vmem:[#allocation20_spill] sm:$0xff]  ;;  %v5710_v58 = vld [vmem:[#allocation33_spill] sm:$0xff]  ;;  %v5711_v35 = vld [vmem:[#allocation26_spill] sm:$0xff] }
 0x1a6   :  { %3073 = vmatpush1.bf16.msra.mxu0 %v5164_v4  ;;  %v5708_v29 = vld [vmem:[#allocation24_spill] sm:$0xff]  ;;  %v5244_v41 = vpack.c.bf16 %v5710_v58, %v5709_v44  ;;  %v5712_v26 = vld [vmem:[#allocation30_spill] sm:$0xff]  ;;  %v5713_v45 = vld [vmem:[#allocation35_spill] sm:$0xff] }
 0x1a7   :  { %3075 = vmatprep.subr.bf16.mxu0 %v5173_v3  ;;  %v5239_v31 = vpack.c.bf16 %v5708_v29, %v5707_v28  ;;  %v5249_v37 = vpack.c.bf16 %v5712_v26, %v5711_v35  ;;  %v5714_v59 = vld [vmem:[#allocation39_spill] sm:$0xff]  ;;  %v5715_v40 = vld [vmem:[#allocation28_spill] sm:$0xff]  ;;  %v5717_v54 = vld [vmem:[#allocation37_spill] sm:$0xff] }
 0x1a8   :  { %3105 = vmatpush1.bf16.msra.mxu1 %v5179_v2  ;;  %v5254_v61 = vpack.c.bf16 %v5714_v59, %v5713_v45  ;;  %v5716_v55 = vld [vmem:[#allocation32_spill] sm:$0xff]  ;;  %v5718_v53 = vld [vmem:[#allocation41_spill] sm:$0xff]  ;;  %v5719_v13 = vld [vmem:[#allocation34_spill] sm:$0xff] }
 0x1a9   :  { %3107 = vmatprep.subr.bf16.mxu1 %v5184_v6  ;;  %v5259_v46 = vpack.c.bf16 %v5716_v55, %v5715_v40  ;;  %v5264_v12 = vpack.c.bf16 %v5718_v53, %v5717_v54  ;;  %v5720_v15 = vld [vmem:[#allocation38_spill] sm:$0xff]  ;;  %v5721_v18 = vld [vmem:[#allocation43_spill] sm:$0xff]  ;;  %v5723_v22 = vld [vmem:[#allocation36_spill] sm:$0xff] }
 0x1aa   :  { %3077 = vmatpush1.bf16.msra.mxu0 %v5189_v7  ;;  %v5269_v16 = vpack.c.bf16 %v5720_v15, %v5719_v13  ;;  %v5722_v19 = vld [vmem:[#allocation47_spill] sm:$0xff]  ;;  %v5724_v24 = vld [vmem:[#allocation40_spill] sm:$0xff]  ;;  %v5725_v28 = vld [vmem:[#allocation45_spill] sm:$0xff] }
 0x1ab   :  { %3079 = vmatprep.subr.bf16.mxu0 %v5194_v8  ;;  %v5274_v21 = vpack.c.bf16 %v5722_v19, %v5721_v18  ;;  %v5279_v25 = vpack.c.bf16 %v5724_v24, %v5723_v22  ;;  %v5726_v29 = vld [vmem:[#allocation49_spill] sm:$0xff]  ;;  %v5727_v58 = vld [vmem:[#allocation42_spill] sm:$0xff]  ;;  %v5729_v45 = vld [vmem:[#allocation44_spill] sm:$0xff] }
 0x1ac   :  { %3109 = vmatpush1.bf16.msra.mxu1 %v5199_v9  ;;  %v5284_v44 = vpack.c.bf16 %v5726_v29, %v5725_v28  ;;  %v5728_v35 = vld [vmem:[#allocation46_spill] sm:$0xff]  ;;  %v5730_v59 = vld [vmem:[#allocation48_spill] sm:$0xff] }
 0x1ad   :  { %3111 = vmatprep.subr.bf16.mxu1 %v5204_v10  ;;  %v5289_v26 = vpack.c.bf16 %v5728_v35, %v5727_v58  ;;  %v5295_v40 = vpack.c.bf16 %v5730_v59, %v5729_v45  ;;  %v5731_v24 = vld [vmem:[#allocation66_spill] sm:$0xff]  ;;  %v5732_v58 = vld [vmem:[#allocation67_spill] sm:$0xff] }
 0x1ae   :  { %3081 = vmatpush1.bf16.msra.mxu0 %v5209_v11 }
 0x1af   :  { %3083 = vmatprep.subr.bf16.mxu0 %v5214_v14 }
 0x1b0   :  { %3113 = vmatpush1.bf16.msra.mxu1 %v5219_v17 }
 0x1b1   :  { %3115 = vmatprep.subr.bf16.mxu1 %v5224_v20 }
 0x1b2   :  { %3085 = vmatpush1.bf16.msra.mxu0 %v5229_v23 }
 0x1b3   :  { %3087 = vmatprep.subr.bf16.mxu0 %v5234_v27 }
 0x1b4   :  { %3117 = vmatpush1.bf16.msra.mxu1 %v5239_v31 }
 0x1b5   :  { %3119 = vmatprep.subr.bf16.mxu1 %v5244_v41 }
 0x1b6   :  { %3089 = vmatpush1.bf16.msra.mxu0 %v5249_v37 }
 0x1b7   :  { %3091 = vmatprep.subr.bf16.mxu0 %v5254_v61 }
 0x1b8   :  { %3121 = vmatpush1.bf16.msra.mxu1 %v5259_v46 }
 0x1b9   :  { %3123 = vmatprep.subr.bf16.mxu1 %v5264_v12 }
 0x1ba   :  { %3093 = vmatpush1.bf16.msra.mxu0 %v5269_v16 }
 0x1bb   :  { %3095 = vmatprep.subr.bf16.mxu0 %v5274_v21 }
 0x1bc   :  { %3125 = vmatpush1.bf16.msra.mxu1 %v5279_v25 }
 0x1bd   :  { %3127 = vmatprep.subr.bf16.mxu1 %v5284_v44 }
 0x1be   :  { %3097 = vmatpush1.bf16.msra.mxu0 %v5289_v26 }
 0x1bf   :  { %3131 = vmatprep.subr.bf16.mxu0 %v5140_v50 }
 0x1c0   :  { %3129 = vmatpush1.bf16.msra.mxu1 %v5295_v40 }
 0x1c1   :  { %1243 = vmatmul.mubr.f32.vlgmr.msra.gmra.mrb[16].mxu0 %v5690_v60  ;;  %3163 = vmatprep.subr.bf16.mxu1 %v5155_v1 }
 0x1c2   :  { %3133 = vmatpush1.bf16.msra.mxu0 %v5144_v47  ;;  %1419 = vmatprep.mubr.f32.mxu0 %v5690_v60 }
 0x1c3   :  { %1314 = vmatmul.mubr.f32.vlgmr.msra.gmra.mrb[16].mxu1 %v5690_v60  ;;  %3135 = vmatprep.subr.bf16.mxu0 %v5148_v49 }
 0x1c4   :  { %3165 = vmatpush1.bf16.msra.mxu1 %v5159_v0  ;;  %1490 = vmatprep.mubr.f32.mxu1 %v5690_v60 }
 0x1c5   :  { %3167 = vmatprep.subr.bf16.mxu1 %v5168_v5 }
 0x1c6   :  { %3137 = vmatpush1.bf16.msra.mxu0 %v5164_v4 }
 0x1c7   :  { %3139 = vmatprep.subr.bf16.mxu0 %v5173_v3 }
 0x1c8   :  { %3169 = vmatpush1.bf16.msra.mxu1 %v5179_v2 }
 0x1c9   :  { %3171 = vmatprep.subr.bf16.mxu1 %v5184_v6 }
 0x1ca   :  { %3141 = vmatpush1.bf16.msra.mxu0 %v5189_v7 }
 0x1cb   :  { %3143 = vmatprep.subr.bf16.mxu0 %v5194_v8 }
 0x1cc   :  { %3173 = vmatpush1.bf16.msra.mxu1 %v5199_v9 }
 0x1cd   :  { %3175 = vmatprep.subr.bf16.mxu1 %v5204_v10 }
 0x1ce   :  { %3145 = vmatpush1.bf16.msra.mxu0 %v5209_v11 }
 0x1cf   :  { %3147 = vmatprep.subr.bf16.mxu0 %v5214_v14 }
 0x1d0   :  { %3177 = vmatpush1.bf16.msra.mxu1 %v5219_v17 }
 0x1d1   :  { %3179 = vmatprep.subr.bf16.mxu1 %v5224_v20 }
 0x1d2   :  { %3149 = vmatpush1.bf16.msra.mxu0 %v5229_v23 }
 0x1d3   :  { %3151 = vmatprep.subr.bf16.mxu0 %v5234_v27 }
 0x1d4   :  { %3181 = vmatpush1.bf16.msra.mxu1 %v5239_v31 }
 0x1d5   :  { %3183 = vmatprep.subr.bf16.mxu1 %v5244_v41 }
 0x1d6   :  { %3153 = vmatpush1.bf16.msra.mxu0 %v5249_v37 }
 0x1d7   :  { %3155 = vmatprep.subr.bf16.mxu0 %v5254_v61 }
 0x1d8   :  { %3185 = vmatpush1.bf16.msra.mxu1 %v5259_v46 }
 0x1d9   :  { %3187 = vmatprep.subr.bf16.mxu1 %v5264_v12 }
 0x1da   :  { %3157 = vmatpush1.bf16.msra.mxu0 %v5269_v16 }
 0x1db   :  { %3159 = vmatprep.subr.bf16.mxu0 %v5274_v21 }
 0x1dc   :  { %3189 = vmatpush1.bf16.msra.mxu1 %v5279_v25 }
 0x1dd   :  { %3191 = vmatprep.subr.bf16.mxu1 %v5284_v44 }
 0x1de   :  { %3161 = vmatpush1.bf16.msra.mxu0 %v5289_v26 }
 0x1df   :  { %3195 = vmatprep.subr.bf16.mxu0 %v5140_v50 }
 0x1e0   :  { %3193 = vmatpush1.bf16.msra.mxu1 %v5295_v40 }
 0x1e1   :  { %3227 = vmatprep.subr.bf16.mxu1 %v5155_v1 }
 0x294   :  { %v1244_v55 = vpop.f32.mrb[16].mxu0 }
 0x295   :  { %v1320_v54 = vadd.f32 %v1244_v55, %v5106_v43  ;;  %v1246_v53 = vpop.f32.mrb[17].mxu0 }
 0x296   :  { %v1321_v13 = vadd.f32 %v1246_v53, %v5108_v52  ;;  %v1315_v15 = vpop.f32.mrb[16].mxu1 }
 0x297   :  { %v2826_v18 = vmul.f32 -1.442695, %v1320_v54  ;;  %v1317_v19 = vpop.f32.mrb[17].mxu1  ;;  %v3650_v28 = vadd.f32 %v1315_v15, %v5731_v24 }
 0x298   :  { %v2827_v22 = vmul.f32 -1.442695, %v1321_v13  ;;  %v3651_v35 = vadd.f32 %v1317_v19, %v5732_v58 }
 0x299   :  { %3706 = vpow2.f32 %v2826_v18  ;;  %v2828_v29 = vmul.f32 -1.442695, %v3650_v28 }
 0x29a   :  { %3708 = vpow2.f32 %v2827_v22 }
 0x29b   :  { %3710 = vpow2.f32 %v2828_v29 }
 0x29c   :  { %3712 = vtanh.f32 %v3651_v35 }
 0x2a3   :  { %v3707_v45 = vpop.eup %3706 }
 0x2a4   :  { %v3709_v59 = vpop.eup %3708  ;;  %v1333_v42 = vadd.f32 1.0, %v3707_v45 }
 0x2a5   :  { %v1334_v43 = vadd.f32 1.0, %v3709_v59  ;;  %v3711_v52 = vpop.eup %3710 }
 0x2a6   :  { %3714 = vrcp.f32 %v1333_v42  ;;  %v3713_v55 = vpop.eup %3712  ;;  %v1335_v53 = vadd.f32 1.0, %v3711_v52 }
 0x2a7   :  { %3716 = vrcp.f32 %v1334_v43 }
 0x2a8   :  { %3718 = vrcp.f32 %v1335_v53 }
 0x2b0   :  { %v3715_v54 = vpop.eup %3714 }
 0x2b1   :  { %v3717_v13 = vpop.eup %3716  ;;  %v1344_v18 = vmul.f32 %v3715_v54, %v3713_v55 }
 0x2b2   :  { %v1343_v22 = vmul.f32 0.0, %v3717_v13  ;;  %v3719_v19 = vpop.eup %3718 }
 0x2b4   :  { %v5342_v15 = vadd.f32 %v1344_v18, %v1343_v22 }
 0x2b6   :  { %3720 = vtanh.f32 %v5342_v15 }
 0x2c0   :  { %v3721_v28 = vpop.eup %3720 }
 0x2c1   :  { %v1347_v29 = vmul.f32 %v3721_v28, %v3719_v19 }
 0x2c3   :  { %1420 = vmatmul.mubr.f32.vlgmr.msra.gmra.mrb[18].mxu0 %v1347_v29  ;;  %1491 = vmatmul.mubr.f32.vlgmr.msra.gmra.mrb[18].mxu1 %v1347_v29 }
 0x2c4   :  { %3197 = vmatpush1.bf16.msra.mxu0 %v5144_v47  ;;  %3229 = vmatpush1.bf16.msra.mxu1 %v5159_v0 }
 0x2c5   :  { %3199 = vmatprep.subr.bf16.mxu0 %v5148_v49  ;;  %3231 = vmatprep.subr.bf16.mxu1 %v5168_v5 }
 0x2c6   :  { %1596 = vmatprep.mubr.f32.mxu0 %v5690_v60  ;;  %1667 = vmatprep.mubr.f32.mxu1 %v5690_v60 }
 0x2c8   :  { %3201 = vmatpush1.bf16.msra.mxu0 %v5164_v4  ;;  %3233 = vmatpush1.bf16.msra.mxu1 %v5179_v2 }
 0x2c9   :  { %3203 = vmatprep.subr.bf16.mxu0 %v5173_v3  ;;  %3235 = vmatprep.subr.bf16.mxu1 %v5184_v6 }
 0x2cc   :  { %3205 = vmatpush1.bf16.msra.mxu0 %v5189_v7  ;;  %3237 = vmatpush1.bf16.msra.mxu1 %v5199_v9 }
 0x2cd   :  { %3207 = vmatprep.subr.bf16.mxu0 %v5194_v8  ;;  %3239 = vmatprep.subr.bf16.mxu1 %v5204_v10 }
 0x2d0   :  { %3209 = vmatpush1.bf16.msra.mxu0 %v5209_v11  ;;  %3241 = vmatpush1.bf16.msra.mxu1 %v5219_v17 }
 0x2d1   :  { %3211 = vmatprep.subr.bf16.mxu0 %v5214_v14  ;;  %3243 = vmatprep.subr.bf16.mxu1 %v5224_v20 }
 0x2d4   :  { %3213 = vmatpush1.bf16.msra.mxu0 %v5229_v23  ;;  %3245 = vmatpush1.bf16.msra.mxu1 %v5239_v31 }
 0x2d5   :  { %3215 = vmatprep.subr.bf16.mxu0 %v5234_v27  ;;  %3247 = vmatprep.subr.bf16.mxu1 %v5244_v41 }
 0x2d8   :  { %3217 = vmatpush1.bf16.msra.mxu0 %v5249_v37  ;;  %3249 = vmatpush1.bf16.msra.mxu1 %v5259_v46 }
 0x2d9   :  { %3219 = vmatprep.subr.bf16.mxu0 %v5254_v61  ;;  %3251 = vmatprep.subr.bf16.mxu1 %v5264_v12 }
 0x2dc   :  { %3221 = vmatpush1.bf16.msra.mxu0 %v5269_v16  ;;  %3253 = vmatpush1.bf16.msra.mxu1 %v5279_v25 }
 0x2dd   :  { %3223 = vmatprep.subr.bf16.mxu0 %v5274_v21  ;;  %3255 = vmatprep.subr.bf16.mxu1 %v5284_v44 }
 0x2e0   :  { %3225 = vmatpush1.bf16.msra.mxu0 %v5289_v26  ;;  %3257 = vmatpush1.bf16.msra.mxu1 %v5295_v40 }
 0x2e1   :  { %3259 = vmatprep.subr.bf16.mxu0 %v5140_v50  ;;  %3291 = vmatprep.subr.bf16.mxu1 %v5155_v1 }
 0x396   :  { %v1421_v42 = vpop.f32.mrb[18].mxu0  ;;  %v1492_v35 = vpop.f32.mrb[18].mxu1 }
 0x397   :  { %v1497_v45 = vadd.f32 %v1421_v42, %v5110_v32  ;;  %v1423_v59 = vpop.f32.mrb[19].mxu0  ;;  %v1494_v43 = vpop.f32.mrb[19].mxu1  ;;  %v3652_v53 = vadd.f32 %v1492_v35, %v5731_v24 }
 0x398   :  { %v1498_v52 = vadd.f32 %v1423_v59, %v5112_v39  ;;  %v3653_v13 = vadd.f32 %v1494_v43, %v5732_v58 }
 0x399   :  { %v2829_v55 = vmul.f32 -1.442695, %v1497_v45  ;;  %v2831_v18 = vmul.f32 -1.442695, %v3652_v53 }
 0x39a   :  { %v2830_v54 = vmul.f32 -1.442695, %v1498_v52 }
 0x39b   :  { %3722 = vpow2.f32 %v2829_v55 }
 0x39c   :  { %3724 = vpow2.f32 %v2830_v54 }
 0x39d   :  { %3726 = vtanh.f32 %v3653_v13 }
 0x39e   :  { %3728 = vpow2.f32 %v2831_v18 }
 0x3a5   :  { %v3723_v22 = vpop.eup %3722 }
 0x3a6   :  { %v1510_v19 = vadd.f32 1.0, %v3723_v22  ;;  %v3725_v28 = vpop.eup %3724 }
 0x3a7   :  { %v1511_v32 = vadd.f32 1.0, %v3725_v28  ;;  %v3727_v29 = vpop.eup %3726 }
 0x3a8   :  { %3730 = vrcp.f32 %v1510_v19  ;;  %v3729_v42 = vpop.eup %3728 }
 0x3a9   :  { %3732 = vrcp.f32 %v1511_v32  ;;  %v1512_v52 = vadd.f32 1.0, %v3729_v42 }
 0x3ab   :  { %3734 = vrcp.f32 %v1512_v52 }
 0x3b2   :  { %v3731_v39 = vpop.eup %3730 }
 0x3b3   :  { %v1521_v45 = vmul.f32 %v3731_v39, %v3727_v29  ;;  %v3733_v59 = vpop.eup %3732 }
 0x3b4   :  { %v1520_v55 = vmul.f32 %v3733_v59, %v5342_v15 }
 0x3b5   :  { %v3735_v43 = vpop.eup %3734 }
 0x3b6   :  { %v5384_v35 = vadd.f32 %v1521_v45, %v1520_v55 }
 0x3b8   :  { %3736 = vtanh.f32 %v5384_v35 }
 0x3c2   :  { %v3737_v54 = vpop.eup %3736 }
 0x3c3   :  { %v1524_v53 = vmul.f32 %v3737_v54, %v3735_v43 }
 0x3c5   :  { %1597 = vmatmul.mubr.f32.vlgmr.msra.gmra.mrb[20].mxu0 %v1524_v53  ;;  %1668 = vmatmul.mubr.f32.vlgmr.msra.gmra.mrb[20].mxu1 %v1524_v53 }
 0x3c6   :  { %3261 = vmatpush1.bf16.msra.mxu0 %v5144_v47  ;;  %3293 = vmatpush1.bf16.msra.mxu1 %v5159_v0 }
 0x3c7   :  { %3263 = vmatprep.subr.bf16.mxu0 %v5148_v49  ;;  %3295 = vmatprep.subr.bf16.mxu1 %v5168_v5 }
 0x3c8   :  { %1773 = vmatprep.mubr.f32.mxu0 %v5690_v60  ;;  %1844 = vmatprep.mubr.f32.mxu1 %v5690_v60 }
 0x3ca   :  { %3265 = vmatpush1.bf16.msra.mxu0 %v5164_v4  ;;  %3297 = vmatpush1.bf16.msra.mxu1 %v5179_v2 }
 0x3cb   :  { %3267 = vmatprep.subr.bf16.mxu0 %v5173_v3  ;;  %3299 = vmatprep.subr.bf16.mxu1 %v5184_v6 }
 0x3ce   :  { %3269 = vmatpush1.bf16.msra.mxu0 %v5189_v7  ;;  %3301 = vmatpush1.bf16.msra.mxu1 %v5199_v9 }
 0x3cf   :  { %3271 = vmatprep.subr.bf16.mxu0 %v5194_v8  ;;  %3303 = vmatprep.subr.bf16.mxu1 %v5204_v10 }
 0x3d2   :  { %3273 = vmatpush1.bf16.msra.mxu0 %v5209_v11  ;;  %3305 = vmatpush1.bf16.msra.mxu1 %v5219_v17 }
 0x3d3   :  { %3275 = vmatprep.subr.bf16.mxu0 %v5214_v14  ;;  %3307 = vmatprep.subr.bf16.mxu1 %v5224_v20 }
 0x3d6   :  { %3277 = vmatpush1.bf16.msra.mxu0 %v5229_v23  ;;  %3309 = vmatpush1.bf16.msra.mxu1 %v5239_v31 }
 0x3d7   :  { %3279 = vmatprep.subr.bf16.mxu0 %v5234_v27  ;;  %3311 = vmatprep.subr.bf16.mxu1 %v5244_v41 }
 0x3da   :  { %3281 = vmatpush1.bf16.msra.mxu0 %v5249_v37  ;;  %3313 = vmatpush1.bf16.msra.mxu1 %v5259_v46 }
 0x3db   :  { %3283 = vmatprep.subr.bf16.mxu0 %v5254_v61  ;;  %3315 = vmatprep.subr.bf16.mxu1 %v5264_v12 }
 0x3de   :  { %3285 = vmatpush1.bf16.msra.mxu0 %v5269_v16  ;;  %3317 = vmatpush1.bf16.msra.mxu1 %v5279_v25 }
 0x3df   :  { %3287 = vmatprep.subr.bf16.mxu0 %v5274_v21  ;;  %3319 = vmatprep.subr.bf16.mxu1 %v5284_v44 }
 0x3e2   :  { %3289 = vmatpush1.bf16.msra.mxu0 %v5289_v26  ;;  %3321 = vmatpush1.bf16.msra.mxu1 %v5295_v40 }
 0x3e3   :  { %3323 = vmatprep.subr.bf16.mxu0 %v5140_v50  ;;  %3355 = vmatprep.subr.bf16.mxu1 %v5155_v1 }
 0x498   :  { %v1598_v15 = vpop.f32.mrb[20].mxu0  ;;  %v1669_v13 = vpop.f32.mrb[20].mxu1 }
 0x499   :  { %v1674_v18 = vadd.f32 %v1598_v15, %v5114_v57  ;;  %v1600_v22 = vpop.f32.mrb[21].mxu0  ;;  %v1671_v19 = vpop.f32.mrb[21].mxu1  ;;  %v3654_v42 = vadd.f32 %v1669_v13, %v5731_v24 }
 0x49a   :  { %v1675_v28 = vadd.f32 %v1600_v22, %v5116_v30  ;;  %v3655_v39 = vadd.f32 %v1671_v19, %v5732_v58 }
 0x49b   :  { %v2832_v32 = vmul.f32 -1.442695, %v1674_v18  ;;  %v2834_v45 = vmul.f32 -1.442695, %v3654_v42 }
 0x49c   :  { %v2833_v29 = vmul.f32 -1.442695, %v1675_v28 }
 0x49d   :  { %3738 = vpow2.f32 %v2832_v32 }
 0x49e   :  { %3740 = vpow2.f32 %v2833_v29 }
 0x49f   :  { %3742 = vtanh.f32 %v3655_v39 }
 0x4a0   :  { %3744 = vpow2.f32 %v2834_v45 }
 0x4a7   :  { %v3739_v59 = vpop.eup %3738 }
 0x4a8   :  { %v1687_v52 = vadd.f32 1.0, %v3739_v59  ;;  %v3741_v55 = vpop.eup %3740 }
 0x4a9   :  { %v1688_v57 = vadd.f32 1.0, %v3741_v55  ;;  %v3743_v43 = vpop.eup %3742 }
 0x4aa   :  { %3746 = vrcp.f32 %v1687_v52  ;;  %v3745_v54 = vpop.eup %3744 }
 0x4ab   :  { %3748 = vrcp.f32 %v1688_v57  ;;  %v1689_v18 = vadd.f32 1.0, %v3745_v54 }
 0x4ad   :  { %3750 = vrcp.f32 %v1689_v18 }
 0x4b4   :  { %v3747_v30 = vpop.eup %3746 }
 0x4b5   :  { %v1698_v53 = vmul.f32 %v3747_v30, %v3743_v43  ;;  %v3749_v15 = vpop.eup %3748 }
 0x4b6   :  { %v1697_v22 = vmul.f32 %v3749_v15, %v5384_v35 }
 0x4b7   :  { %v3751_v19 = vpop.eup %3750 }
 0x4b8   :  { %v5426_v13 = vadd.f32 %v1698_v53, %v1697_v22 }
 0x4ba   :  { %3752 = vtanh.f32 %v5426_v13 }
 0x4c4   :  { %v3753_v28 = vpop.eup %3752 }
 0x4c5   :  { %v1701_v32 = vmul.f32 %v3753_v28, %v3751_v19 }
 0x4c7   :  { %1774 = vmatmul.mubr.f32.vlgmr.msra.gmra.mrb[22].mxu0 %v1701_v32  ;;  %1845 = vmatmul.mubr.f32.vlgmr.msra.gmra.mrb[22].mxu1 %v1701_v32 }
 0x4c8   :  { %3325 = vmatpush1.bf16.msra.mxu0 %v5144_v47  ;;  %3357 = vmatpush1.bf16.msra.mxu1 %v5159_v0 }
 0x4c9   :  { %3327 = vmatprep.subr.bf16.mxu0 %v5148_v49  ;;  %3359 = vmatprep.subr.bf16.mxu1 %v5168_v5 }
 0x4ca   :  { %1950 = vmatprep.mubr.f32.mxu0 %v5690_v60  ;;  %2021 = vmatprep.mubr.f32.mxu1 %v5690_v60 }
 0x4cc   :  { %3329 = vmatpush1.bf16.msra.mxu0 %v5164_v4  ;;  %3361 = vmatpush1.bf16.msra.mxu1 %v5179_v2 }
 0x4cd   :  { %3331 = vmatprep.subr.bf16.mxu0 %v5173_v3  ;;  %3363 = vmatprep.subr.bf16.mxu1 %v5184_v6 }
 0x4d0   :  { %3333 = vmatpush1.bf16.msra.mxu0 %v5189_v7  ;;  %3365 = vmatpush1.bf16.msra.mxu1 %v5199_v9 }
 0x4d1   :  { %3335 = vmatprep.subr.bf16.mxu0 %v5194_v8  ;;  %3367 = vmatprep.subr.bf16.mxu1 %v5204_v10 }
 0x4d4   :  { %3337 = vmatpush1.bf16.msra.mxu0 %v5209_v11  ;;  %3369 = vmatpush1.bf16.msra.mxu1 %v5219_v17 }
 0x4d5   :  { %3339 = vmatprep.subr.bf16.mxu0 %v5214_v14  ;;  %3371 = vmatprep.subr.bf16.mxu1 %v5224_v20 }
 0x4d8   :  { %3341 = vmatpush1.bf16.msra.mxu0 %v5229_v23  ;;  %3373 = vmatpush1.bf16.msra.mxu1 %v5239_v31 }
 0x4d9   :  { %3343 = vmatprep.subr.bf16.mxu0 %v5234_v27  ;;  %3375 = vmatprep.subr.bf16.mxu1 %v5244_v41 }
 0x4dc   :  { %3345 = vmatpush1.bf16.msra.mxu0 %v5249_v37  ;;  %3377 = vmatpush1.bf16.msra.mxu1 %v5259_v46 }
 0x4dd   :  { %3347 = vmatprep.subr.bf16.mxu0 %v5254_v61  ;;  %3379 = vmatprep.subr.bf16.mxu1 %v5264_v12 }
 0x4e0   :  { %3349 = vmatpush1.bf16.msra.mxu0 %v5269_v16  ;;  %3381 = vmatpush1.bf16.msra.mxu1 %v5279_v25 }
 0x4e1   :  { %3351 = vmatprep.subr.bf16.mxu0 %v5274_v21  ;;  %3383 = vmatprep.subr.bf16.mxu1 %v5284_v44 }
 0x4e4   :  { %3353 = vmatpush1.bf16.msra.mxu0 %v5289_v26  ;;  %3385 = vmatpush1.bf16.msra.mxu1 %v5295_v40 }
 0x4e5   :  { %3387 = vmatprep.subr.bf16.mxu0 %v5140_v50  ;;  %3419 = vmatprep.subr.bf16.mxu1 %v5155_v1 }
 0x59a   :  { %v1775_v35 = vpop.f32.mrb[22].mxu0  ;;  %v1846_v29 = vpop.f32.mrb[22].mxu1 }
 0x59b   :  { %v1851_v42 = vadd.f32 %v1775_v35, %v5118_v51  ;;  %v1777_v39 = vpop.f32.mrb[23].mxu0  ;;  %v1848_v45 = vpop.f32.mrb[23].mxu1  ;;  %v3656_v57 = vadd.f32 %v1846_v29, %v5731_v24 }
 0x59c   :  { %v1852_v59 = vadd.f32 %v1777_v39, %v5120_v62  ;;  %v3657_v43 = vadd.f32 %v1848_v45, %v5732_v58 }
 0x59d   :  { %v2835_v52 = vmul.f32 -1.442695, %v1851_v42  ;;  %v2837_v54 = vmul.f32 -1.442695, %v3656_v57 }
 0x59e   :  { %v2836_v55 = vmul.f32 -1.442695, %v1852_v59 }
 0x59f   :  { %3754 = vpow2.f32 %v2835_v52 }
 0x5a0   :  { %3756 = vpow2.f32 %v2836_v55 }
 0x5a1   :  { %3758 = vtanh.f32 %v3657_v43 }
 0x5a2   :  { %3760 = vpow2.f32 %v2837_v54 }
 0x5a9   :  { %v3755_v30 = vpop.eup %3754 }
 0x5aa   :  { %v1864_v53 = vadd.f32 1.0, %v3755_v30  ;;  %v3757_v15 = vpop.eup %3756 }
 0x5ab   :  { %v1865_v51 = vadd.f32 1.0, %v3757_v15  ;;  %v3759_v18 = vpop.eup %3758 }
 0x5ac   :  { %3762 = vrcp.f32 %v1864_v53  ;;  %v3761_v22 = vpop.eup %3760 }
 0x5ad   :  { %3764 = vrcp.f32 %v1865_v51  ;;  %v1866_v32 = vadd.f32 1.0, %v3761_v22 }
 0x5af   :  { %3766 = vrcp.f32 %v1866_v32 }
 0x5b6   :  { %v3763_v62 = vpop.eup %3762 }
 0x5b7   :  { %v1875_v19 = vmul.f32 %v3763_v62, %v3759_v18  ;;  %v3765_v28 = vpop.eup %3764 }
 0x5b8   :  { %v1874_v35 = vmul.f32 %v3765_v28, %v5426_v13 }
 0x5b9   :  { %v3767_v42 = vpop.eup %3766 }
 0x5ba   :  { %v5468_v29 = vadd.f32 %v1875_v19, %v1874_v35 }
 0x5bc   :  { %3768 = vtanh.f32 %v5468_v29 }
 0x5c6   :  { %v3769_v39 = vpop.eup %3768 }
 0x5c7   :  { %v1878_v45 = vmul.f32 %v3769_v39, %v3767_v42 }
 0x5c9   :  { %1951 = vmatmul.mubr.f32.vlgmr.msra.gmra.mrb[24].mxu0 %v1878_v45  ;;  %2022 = vmatmul.mubr.f32.vlgmr.msra.gmra.mrb[24].mxu1 %v1878_v45 }
 0x5ca   :  { %3389 = vmatpush1.bf16.msra.mxu0 %v5144_v47  ;;  %3421 = vmatpush1.bf16.msra.mxu1 %v5159_v0 }
 0x5cb   :  { %3391 = vmatprep.subr.bf16.mxu0 %v5148_v49  ;;  %3423 = vmatprep.subr.bf16.mxu1 %v5168_v5 }
 0x5cc   :  { %2127 = vmatprep.mubr.f32.mxu0 %v5690_v60  ;;  %2198 = vmatprep.mubr.f32.mxu1 %v5690_v60 }
 0x5ce   :  { %3393 = vmatpush1.bf16.msra.mxu0 %v5164_v4  ;;  %3425 = vmatpush1.bf16.msra.mxu1 %v5179_v2 }
 0x5cf   :  { %3395 = vmatprep.subr.bf16.mxu0 %v5173_v3  ;;  %3427 = vmatprep.subr.bf16.mxu1 %v5184_v6 }
 0x5d2   :  { %3397 = vmatpush1.bf16.msra.mxu0 %v5189_v7  ;;  %3429 = vmatpush1.bf16.msra.mxu1 %v5199_v9 }
 0x5d3   :  { %3399 = vmatprep.subr.bf16.mxu0 %v5194_v8  ;;  %3431 = vmatprep.subr.bf16.mxu1 %v5204_v10 }
 0x5d6   :  { %3401 = vmatpush1.bf16.msra.mxu0 %v5209_v11  ;;  %3433 = vmatpush1.bf16.msra.mxu1 %v5219_v17 }
 0x5d7   :  { %3403 = vmatprep.subr.bf16.mxu0 %v5214_v14  ;;  %3435 = vmatprep.subr.bf16.mxu1 %v5224_v20 }
 0x5da   :  { %3405 = vmatpush1.bf16.msra.mxu0 %v5229_v23  ;;  %3437 = vmatpush1.bf16.msra.mxu1 %v5239_v31 }
 0x5db   :  { %3407 = vmatprep.subr.bf16.mxu0 %v5234_v27  ;;  %3439 = vmatprep.subr.bf16.mxu1 %v5244_v41 }
 0x5de   :  { %3409 = vmatpush1.bf16.msra.mxu0 %v5249_v37  ;;  %3441 = vmatpush1.bf16.msra.mxu1 %v5259_v46 }
 0x5df   :  { %3411 = vmatprep.subr.bf16.mxu0 %v5254_v61  ;;  %3443 = vmatprep.subr.bf16.mxu1 %v5264_v12 }
 0x5e2   :  { %3413 = vmatpush1.bf16.msra.mxu0 %v5269_v16  ;;  %3445 = vmatpush1.bf16.msra.mxu1 %v5279_v25 }
 0x5e3   :  { %3415 = vmatprep.subr.bf16.mxu0 %v5274_v21  ;;  %3447 = vmatprep.subr.bf16.mxu1 %v5284_v44 }
 0x5e6   :  { %3417 = vmatpush1.bf16.msra.mxu0 %v5289_v26  ;;  %3449 = vmatpush1.bf16.msra.mxu1 %v5295_v40 }
 0x5e7   :  { %3451 = vmatprep.subr.bf16.mxu0 %v5140_v50  ;;  %3483 = vmatprep.subr.bf16.mxu1 %v5155_v1 }
 0x69c   :  { %v1952_v13 = vpop.f32.mrb[24].mxu0  ;;  %v2023_v59 = vpop.f32.mrb[24].mxu1 }
 0x69d   :  { %v2028_v52 = vadd.f32 %v1952_v13, %v5122_v63  ;;  %v1954_v55 = vpop.f32.mrb[25].mxu0  ;;  %v2025_v57 = vpop.f32.mrb[25].mxu1  ;;  %v3658_v53 = vadd.f32 %v2023_v59, %v5731_v24 }
 0x69e   :  { %v2029_v43 = vadd.f32 %v1954_v55, %v5124_v56  ;;  %v3659_v15 = vadd.f32 %v2025_v57, %v5732_v58 }
 0x69f   :  { %v2838_v54 = vmul.f32 -1.442695, %v2028_v52  ;;  %v2840_v51 = vmul.f32 -1.442695, %v3658_v53 }
 0x6a0   :  { %v2839_v30 = vmul.f32 -1.442695, %v2029_v43 }
 0x6a1   :  { %3770 = vpow2.f32 %v2838_v54 }
 0x6a2   :  { %3772 = vpow2.f32 %v2839_v30 }
 0x6a3   :  { %3774 = vtanh.f32 %v3659_v15 }
 0x6a4   :  { %3776 = vpow2.f32 %v2840_v51 }
 0x6ab   :  { %v3771_v18 = vpop.eup %3770 }
 0x6ac   :  { %v2041_v22 = vadd.f32 1.0, %v3771_v18  ;;  %v3773_v62 = vpop.eup %3772 }
 0x6ad   :  { %v2042_v63 = vadd.f32 1.0, %v3773_v62  ;;  %v3775_v19 = vpop.eup %3774 }
 0x6ae   :  { %3778 = vrcp.f32 %v2041_v22  ;;  %v3777_v28 = vpop.eup %3776 }
 0x6af   :  { %3780 = vrcp.f32 %v2042_v63  ;;  %v2043_v42 = vadd.f32 1.0, %v3777_v28 }
 0x6b1   :  { %3782 = vrcp.f32 %v2043_v42 }
 0x6b8   :  { %v3779_v56 = vpop.eup %3778 }
 0x6b9   :  { %v2052_v32 = vmul.f32 %v3779_v56, %v3775_v19  ;;  %v3781_v35 = vpop.eup %3780 }
 0x6ba   :  { %v2051_v39 = vmul.f32 %v3781_v35, %v5468_v29 }
 0x6bb   :  { %v3783_v13 = vpop.eup %3782 }
 0x6bc   :  { %v5510_v45 = vadd.f32 %v2052_v32, %v2051_v39 }
 0x6be   :  { %3784 = vtanh.f32 %v5510_v45 }
 0x6c8   :  { %v3785_v59 = vpop.eup %3784 }
 0x6c9   :  { %v2055_v52 = vmul.f32 %v3785_v59, %v3783_v13 }
 0x6cb   :  { %2128 = vmatmul.mubr.f32.vlgmr.msra.gmra.mrb[26].mxu0 %v2055_v52  ;;  %2199 = vmatmul.mubr.f32.vlgmr.msra.gmra.mrb[26].mxu1 %v2055_v52 }
 0x6cc   :  { %3453 = vmatpush1.bf16.msra.mxu0 %v5144_v47  ;;  %3485 = vmatpush1.bf16.msra.mxu1 %v5159_v0 }
 0x6cd   :  { %3455 = vmatprep.subr.bf16.mxu0 %v5148_v49  ;;  %3487 = vmatprep.subr.bf16.mxu1 %v5168_v5 }
 0x6ce   :  { %2304 = vmatprep.mubr.f32.mxu0 %v5690_v60  ;;  %2375 = vmatprep.mubr.f32.mxu1 %v5690_v60 }
 0x6d0   :  { %3457 = vmatpush1.bf16.msra.mxu0 %v5164_v4  ;;  %3489 = vmatpush1.bf16.msra.mxu1 %v5179_v2 }
 0x6d1   :  { %3459 = vmatprep.subr.bf16.mxu0 %v5173_v3  ;;  %3491 = vmatprep.subr.bf16.mxu1 %v5184_v6 }
 0x6d4   :  { %3461 = vmatpush1.bf16.msra.mxu0 %v5189_v7  ;;  %3493 = vmatpush1.bf16.msra.mxu1 %v5199_v9 }
 0x6d5   :  { %3463 = vmatprep.subr.bf16.mxu0 %v5194_v8  ;;  %3495 = vmatprep.subr.bf16.mxu1 %v5204_v10 }
 0x6d8   :  { %3465 = vmatpush1.bf16.msra.mxu0 %v5209_v11  ;;  %3497 = vmatpush1.bf16.msra.mxu1 %v5219_v17 }
 0x6d9   :  { %3467 = vmatprep.subr.bf16.mxu0 %v5214_v14  ;;  %3499 = vmatprep.subr.bf16.mxu1 %v5224_v20 }
 0x6dc   :  { %3469 = vmatpush1.bf16.msra.mxu0 %v5229_v23  ;;  %3501 = vmatpush1.bf16.msra.mxu1 %v5239_v31 }
 0x6dd   :  { %3471 = vmatprep.subr.bf16.mxu0 %v5234_v27  ;;  %3503 = vmatprep.subr.bf16.mxu1 %v5244_v41 }
 0x6e0   :  { %3473 = vmatpush1.bf16.msra.mxu0 %v5249_v37  ;;  %3505 = vmatpush1.bf16.msra.mxu1 %v5259_v46 }
 0x6e1   :  { %3475 = vmatprep.subr.bf16.mxu0 %v5254_v61  ;;  %3507 = vmatprep.subr.bf16.mxu1 %v5264_v12 }
 0x6e4   :  { %3477 = vmatpush1.bf16.msra.mxu0 %v5269_v16  ;;  %3509 = vmatpush1.bf16.msra.mxu1 %v5279_v25 }
 0x6e5   :  { %3479 = vmatprep.subr.bf16.mxu0 %v5274_v21  ;;  %3511 = vmatprep.subr.bf16.mxu1 %v5284_v44 }
 0x6e8   :  { %3481 = vmatpush1.bf16.msra.mxu0 %v5289_v26  ;;  %3513 = vmatpush1.bf16.msra.mxu1 %v5295_v40 }
 0x6e9   :  { %3515 = vmatprep.subr.bf16.mxu0 %v5140_v50  ;;  %3547 = vmatprep.subr.bf16.mxu1 %v5155_v1 }
 0x79e   :  { %v2129_v29 = vpop.f32.mrb[26].mxu0  ;;  %v2200_v55 = vpop.f32.mrb[26].mxu1 }
 0x79f   :  { %v2205_v57 = vadd.f32 %v2129_v29, %v5126_v33  ;;  %v2131_v43 = vpop.f32.mrb[27].mxu0  ;;  %v2202_v54 = vpop.f32.mrb[27].mxu1  ;;  %v3660_v51 = vadd.f32 %v2200_v55, %v5731_v24 }
 0x7a0   :  { %v2206_v30 = vadd.f32 %v2131_v43, %v5128_v36  ;;  %v3661_v18 = vadd.f32 %v2202_v54, %v5732_v58 }
 0x7a1   :  { %v2841_v53 = vmul.f32 -1.442695, %v2205_v57  ;;  %v2843_v22 = vmul.f32 -1.442695, %v3660_v51 }
 0x7a2   :  { %v2842_v15 = vmul.f32 -1.442695, %v2206_v30 }
 0x7a3   :  { %3786 = vpow2.f32 %v2841_v53 }
 0x7a4   :  { %3788 = vpow2.f32 %v2842_v15 }
 0x7a5   :  { %3790 = vtanh.f32 %v3661_v18 }
 0x7a6   :  { %3792 = vpow2.f32 %v2843_v22 }
 0x7ad   :  { %v3787_v50 = vpop.eup %3786 }
 0x7ae   :  { %v2218_v62 = vadd.f32 1.0, %v3787_v50  ;;  %v3789_v1 = vpop.eup %3788 }
 0x7af   :  { %v2219_v33 = vadd.f32 1.0, %v3789_v1  ;;  %v3791_v63 = vpop.eup %3790 }
 0x7b0   :  { %3794 = vrcp.f32 %v2218_v62  ;;  %v3793_v19 = vpop.eup %3792 }
 0x7b1   :  { %3796 = vrcp.f32 %v2219_v33  ;;  %v2220_v32 = vadd.f32 1.0, %v3793_v19 }
 0x7b3   :  { %3798 = vrcp.f32 %v2220_v32 }
 0x7ba   :  { %v3795_v36 = vpop.eup %3794 }
 0x7bb   :  { %v2229_v28 = vmul.f32 %v3795_v36, %v3791_v63  ;;  %v3797_v56 = vpop.eup %3796 }
 0x7bc   :  { %v2228_v35 = vmul.f32 %v3797_v56, %v5510_v45 }
 0x7bd   :  { %v3799_v39 = vpop.eup %3798 }
 0x7be   :  { %v5552_v42 = vadd.f32 %v2229_v28, %v2228_v35 }
 0x7c0   :  { %3800 = vtanh.f32 %v5552_v42 }
 0x7ca   :  { %v3801_v13 = vpop.eup %3800 }
 0x7cb   :  { %v2232_v59 = vmul.f32 %v3801_v13, %v3799_v39 }
 0x7cd   :  { %2305 = vmatmul.mubr.f32.vlgmr.msra.gmra.mrb[28].mxu0 %v2232_v59  ;;  %2376 = vmatmul.mubr.f32.vlgmr.msra.gmra.mrb[28].mxu1 %v2232_v59 }
 0x7ce   :  { %3517 = vmatpush1.bf16.msra.mxu0 %v5144_v47  ;;  %3549 = vmatpush1.bf16.msra.mxu1 %v5159_v0 }
 0x7cf   :  { %3519 = vmatprep.subr.bf16.mxu0 %v5148_v49  ;;  %3551 = vmatprep.subr.bf16.mxu1 %v5168_v5 }
 0x7d0   :  { %2481 = vmatprep.mubr.f32.mxu0 %v5690_v60  ;;  %2552 = vmatprep.mubr.f32.mxu1 %v5690_v60 }
 0x7d2   :  { %3521 = vmatpush1.bf16.msra.mxu0 %v5164_v4  ;;  %3553 = vmatpush1.bf16.msra.mxu1 %v5179_v2 }
 0x7d3   :  { %3523 = vmatprep.subr.bf16.mxu0 %v5173_v3  ;;  %3555 = vmatprep.subr.bf16.mxu1 %v5184_v6 }
 0x7d6   :  { %3525 = vmatpush1.bf16.msra.mxu0 %v5189_v7  ;;  %3557 = vmatpush1.bf16.msra.mxu1 %v5199_v9 }
 0x7d7   :  { %3527 = vmatprep.subr.bf16.mxu0 %v5194_v8  ;;  %3559 = vmatprep.subr.bf16.mxu1 %v5204_v10 }
 0x7da   :  { %3529 = vmatpush1.bf16.msra.mxu0 %v5209_v11  ;;  %3561 = vmatpush1.bf16.msra.mxu1 %v5219_v17 }
 0x7db   :  { %3531 = vmatprep.subr.bf16.mxu0 %v5214_v14  ;;  %3563 = vmatprep.subr.bf16.mxu1 %v5224_v20 }
 0x7de   :  { %3533 = vmatpush1.bf16.msra.mxu0 %v5229_v23  ;;  %3565 = vmatpush1.bf16.msra.mxu1 %v5239_v31 }
 0x7df   :  { %3535 = vmatprep.subr.bf16.mxu0 %v5234_v27  ;;  %3567 = vmatprep.subr.bf16.mxu1 %v5244_v41 }
 0x7e2   :  { %3537 = vmatpush1.bf16.msra.mxu0 %v5249_v37  ;;  %3569 = vmatpush1.bf16.msra.mxu1 %v5259_v46 }
 0x7e3   :  { %3539 = vmatprep.subr.bf16.mxu0 %v5254_v61  ;;  %3571 = vmatprep.subr.bf16.mxu1 %v5264_v12 }
 0x7e6   :  { %3541 = vmatpush1.bf16.msra.mxu0 %v5269_v16  ;;  %3573 = vmatpush1.bf16.msra.mxu1 %v5279_v25 }
 0x7e7   :  { %3543 = vmatprep.subr.bf16.mxu0 %v5274_v21  ;;  %3575 = vmatprep.subr.bf16.mxu1 %v5284_v44 }
 0x7ea   :  { %3545 = vmatpush1.bf16.msra.mxu0 %v5289_v26  ;;  %3577 = vmatpush1.bf16.msra.mxu1 %v5295_v40  ;;  %v5733_v40 = vld [vmem:[#allocation68_spill] sm:$0xff] }
 0x8a0   :  { %v2306_v47 = vpop.f32.mrb[28].mxu0  ;;  %v2377_v49 = vpop.f32.mrb[28].mxu1 }
 0x8a1   :  { %v2382_v0 = vadd.f32 %v2306_v47, %v5130_v38  ;;  %v2308_v4 = vpop.f32.mrb[29].mxu0  ;;  %v2379_v5 = vpop.f32.mrb[29].mxu1  ;;  %v3662_v7 = vadd.f32 %v2377_v49, %v5731_v24 }
 0x8a2   :  { %v2383_v3 = vadd.f32 %v2308_v4, %v5132_v48  ;;  %v3663_v8 = vadd.f32 %v2379_v5, %v5732_v58 }
 0x8a3   :  { %v2844_v2 = vmul.f32 -1.442695, %v2382_v0  ;;  %v2846_v9 = vmul.f32 -1.442695, %v3662_v7 }
 0x8a4   :  { %v2845_v6 = vmul.f32 -1.442695, %v2383_v3 }
 0x8a5   :  { %3802 = vpow2.f32 %v2844_v2 }
 0x8a6   :  { %3804 = vpow2.f32 %v2845_v6 }
 0x8a7   :  { %3806 = vtanh.f32 %v3663_v8 }
 0x8a8   :  { %3808 = vpow2.f32 %v2846_v9 }
 0x8af   :  { %v3803_v10 = vpop.eup %3802 }
 0x8b0   :  { %v2395_v11 = vadd.f32 1.0, %v3803_v10  ;;  %v3805_v14 = vpop.eup %3804 }
 0x8b1   :  { %v2396_v38 = vadd.f32 1.0, %v3805_v14  ;;  %v3807_v17 = vpop.eup %3806 }
 0x8b2   :  { %3810 = vrcp.f32 %v2395_v11  ;;  %v3809_v20 = vpop.eup %3808 }
 0x8b3   :  { %3812 = vrcp.f32 %v2396_v38  ;;  %v2397_v31 = vadd.f32 1.0, %v3809_v20 }
 0x8b5   :  { %3814 = vrcp.f32 %v2397_v31 }
 0x8bc   :  { %v3811_v48 = vpop.eup %3810 }
 0x8bd   :  { %v2406_v23 = vmul.f32 %v3811_v48, %v3807_v17  ;;  %v3813_v27 = vpop.eup %3812 }
 0x8be   :  { %v2405_v41 = vmul.f32 %v3813_v27, %v5552_v42 }
 0x8bf   :  { %v3815_v61 = vpop.eup %3814 }
 0x8c0   :  { %v2407_v37 = vadd.f32 %v2406_v23, %v2405_v41 }
 0x8c2   :  { %3816 = vtanh.f32 %v2407_v37 }
 0x8cc   :  { %v3817_v46 = vpop.eup %3816 }
 0x8cd   :  { %v2409_v12 = vmul.f32 %v3817_v46, %v3815_v61 }
 0x8cf   :  { %2482 = vmatmul.mubr.f32.vlgmr.msra.gmra.mrb[30].mxu0 %v2409_v12  ;;  %2553 = vmatmul.mubr.f32.vlgmr.msra.gmra.mrb[30].mxu1 %v2409_v12 }
 0x9a2   :  { %v2483_v16 = vpop.f32.mrb[30].mxu0  ;;  %v2554_v21 = vpop.f32.mrb[30].mxu1 }
 0x9a3   :  { %v2559_v25 = vadd.f32 %v2483_v16, %v5134_v34  ;;  %v2485_v44 = vpop.f32.mrb[31].mxu0  ;;  %v2556_v26 = vpop.f32.mrb[31].mxu1  ;;  %v3664_v55 = vadd.f32 %v2554_v21, %v5731_v24 }
 0x9a4   :  { %v2560_v45 = vadd.f32 %v2485_v44, %v5733_v40  ;;  %v3665_v57 = vadd.f32 %v2556_v26, %v5732_v58 }
 0x9a5   :  { %v2847_v52 = vmul.f32 -1.442695, %v2559_v25  ;;  %v2849_v43 = vmul.f32 -1.442695, %v3664_v55 }
 0x9a6   :  { %v2848_v29 = vmul.f32 -1.442695, %v2560_v45 }
 0x9a7   :  { %3818 = vpow2.f32 %v2847_v52 }
 0x9a8   :  { %3820 = vpow2.f32 %v2848_v29 }
 0x9a9   :  { %3822 = vtanh.f32 %v3665_v57 }
 0x9aa   :  { %3824 = vpow2.f32 %v2849_v43 }
 0x9b1   :  { %v3819_v54 = vpop.eup %3818 }
 0x9b2   :  { %v2572_v30 = vadd.f32 1.0, %v3819_v54  ;;  %v3821_v53 = vpop.eup %3820 }
 0x9b3   :  { %v2573_v34 = vadd.f32 1.0, %v3821_v53  ;;  %v3823_v15 = vpop.eup %3822 }
 0x9b4   :  { %3826 = vrcp.f32 %v2572_v30  ;;  %v3825_v51 = vpop.eup %3824 }
 0x9b5   :  { %3828 = vrcp.f32 %v2573_v34  ;;  %v2574_v62 = vadd.f32 1.0, %v3825_v51 }
 0x9b7   :  { %3830 = vrcp.f32 %v2574_v62 }
 0x9be   :  { %v3827_v18 = vpop.eup %3826 }
 0x9bf   :  { %v2583_v22 = vmul.f32 %v3827_v18, %v3823_v15  ;;  %v3829_v50 = vpop.eup %3828 }
 0x9c0   :  { %v2582_v1 = vmul.f32 %v3829_v50, %v2407_v37 }
 0x9c1   :  { %v3831_v24 = vpop.eup %3830 }
 0x9c2   :  { %v2584_v33 = vadd.f32 %v2583_v22, %v2582_v1 }
 0x9c4   :  { %3832 = vtanh.f32 %v2584_v33 }
 0x9ce   :  { %v3833_v58 = vpop.eup %3832 }
 0x9cf   :  { %v2586_v63 = vmul.f32 %v3833_v58, %v3831_v24 }
 0x9d0   :  { %3858 = dma.done.wait [#allocation6 + $0x1], 2048 }
 0x9d1   :  { %3859 = vsyncadd [#allocation6 + $0x1], 4294965248  ;;  %v5734_v19 = vld [vmem:[#allocation50_spill] sm:$0xff]  ;;  %v5735_v36 = vld [vmem:[#allocation51_spill] sm:$0xff] }
 0x9d2   :  { %v3579_v28 = vpack.c.bf16 %v5735_v36, %v5734_v19 }
 0x9d3   :  { %3860 = dma.done.wait [#allocation6 + $0x2], 16 }
 0x9d4   :  { %3861 = vsyncadd [#allocation6 + $0x2], 4294967280  ;;  %v3867_v56 = vmov 0.0|0.0   ;;  %v5736_v32 = vld [vmem:[#allocation52_spill] sm:$0xff]  ;;  %v5737_v35 = vld [vmem:[#allocation53_spill] sm:$0xff]  ;;  %vm3868_vm0 = vmmov 0  }
 0x9d5   :  { %3578 = vmatprep.subr.bf16.mxu0 %v3867_v56  ;;  %v3582_v42 = vpack.c.bf16 %v5737_v35, %v5736_v32  ;;  %2903 = vmatprep.mubr.msk.f32.mxu0 %vm3868_vm0, %v5690_v60  ;;  %v5738_v39 = vld [vmem:[#allocation54_spill] sm:$0xff]  ;;  %v5739_v13 = vld [vmem:[#allocation55_spill] sm:$0xff]  ;;  %v5740_v47 = vld [vmem:[#allocation56_spill] sm:$0xff]  ;;  %s3869_s1 = smov [#allocation7]  }
 0x9d6   :  { %3580 = vmatpush3.bf16.msra.mxu0 %v3579_v28  ;;  %v3585_v59 = vpack.c.bf16 %v5739_v13, %v5738_v39  ;;  %v5741_v49 = vld [vmem:[#allocation57_spill] sm:$0xff]  ;;  %v5742_v4 = vld [vmem:[#allocation58_spill] sm:$0xff]  ;;  %v5743_v5 = vld [vmem:[#allocation59_spill] sm:$0xff]  ;;  %s2693_s12 = sshll.u32 %s3869_s1, 4  ;;  %s2694_s12 = int_to_ptr.vmem [resolvable:$true] %s2693_s12 }
 0x9d7   :  { %3581 = vmatprep.subr.bf16.mxu0 %v3867_v56  ;;  %v3588_v0 = vpack.c.bf16 %v5741_v49, %v5740_v47  ;;  %v3591_v3 = vpack.c.bf16 %v5743_v5, %v5742_v4  ;;  %v5744_v2 = vld [vmem:[#allocation60_spill] sm:$0xff]  ;;  %v5745_v6 = vld [vmem:[#allocation61_spill] sm:$0xff]  ;;  %v5746_v60 = vld [vmem:[#allocation62_spill] sm:$0xff]  ;;  %s3834_s3 = scalar_lea.vmem %s2694_s12, 128  ;;  %p3839_p1 = scmp.lt.s32.totalorder %s2694_s12, %s2694_s12 }
 0x9d8   :  { %v3594_v7 = vpack.c.bf16 %v5745_v6, %v5744_v2  ;;  %v5747_v8 = vld [vmem:[#allocation63_spill] sm:$0xff]  ;;  %v5748_v10 = vld [vmem:[#allocation64_spill] sm:$0xff]  ;;  %v5749_v11 = vld [vmem:[#allocation65_spill] sm:$0xff]  ;;  %p3835_p0 = scmp.ne.s32.totalorder %s2694_s12, %s3834_s3  ;;  %p3840_p2 = scmp.lt.s32.totalorder %s3834_s3, %s3834_s3 }
 0x9d9   :  { %v3597_v9 = vpack.c.bf16 %v5747_v8, %v5746_v60  ;;  %v3600_v14 = vpack.c.bf16 %v5749_v11, %v5748_v10  ;;  %v2850_v38 = vld [vmem:[#allocation5] ss:$0 sm:$0xff] }
 0x9da   :  { %3583 = vmatpush3.bf16.msra.mxu0 %v3582_v42  ;;  %p3841_p3 = por %p3840_p2, %p3839_p1 }
 0x9db   :  { %3584 = vmatprep.subr.bf16.mxu0 %v3867_v56 }
 0x9dc   :  { %p3842_p4 = pnand %p3841_p3, %p3835_p0 }
 0x9de   :  { %3586 = vmatpush3.bf16.msra.mxu0 %v3585_v59 }
 0x9df   :  { %3587 = vmatprep.subr.bf16.mxu0 %v3867_v56 }
 0x9e2   :  { %3589 = vmatpush3.bf16.msra.mxu0 %v3588_v0 }
 0x9e3   :  { %3590 = vmatprep.subr.bf16.mxu0 %v3867_v56 }
 0x9e6   :  { %3592 = vmatpush3.bf16.msra.mxu0 %v3591_v3 }
 0x9e7   :  { %3593 = vmatprep.subr.bf16.mxu0 %v3867_v56 }
 0x9ea   :  { %3595 = vmatpush3.bf16.msra.mxu0 %v3594_v7 }
 0x9eb   :  { %3596 = vmatprep.subr.bf16.mxu0 %v3867_v56 }
 0x9ee   :  { %3598 = vmatpush3.bf16.msra.mxu0 %v3597_v9 }
 0x9ef   :  { %3599 = vmatprep.subr.bf16.mxu0 %v3867_v56 }
 0x9f2   :  { %3601 = vmatpush3.bf16.msra.mxu0 %v3600_v14 }
 0x9f5   :  { %2904 = vmatmul.mubr.f32.vlgmr.msra.gmra.mrb[32].mxu0 %v2586_v63 }
 0xac8   :  { %v2682_v17 = vpop.f32.mrb[32].mxu0 }
 0xac9   :  { %v2683_v20 = vadd.f32 %v2850_v38, %v2682_v17  ;;  %v2905_v48 = vpop.f32.mrb[33].mxu0 }
 0xacb   :  { %2686 = vst [vmem:[#allocation7] sm:$0xff] %v2683_v20 }
 0xacc   :  { %3845 = shalt.err (!%p3842_p4)
}
 0xacd   :  { %s3846_s15 = scalar_lea.hbm %s5631_s6, 128 }
 0xace   :  { %p3847_p5 = scmp.ne.s32.totalorder %s5631_s6, %s3846_s15  ;;  %p3850_p6 = scmp.lt.u32.totalorder %s3846_s15, %s5631_s6 }
 0xad0   :  { %p3852_p7 = pnand %p3850_p6, %p3847_p5 }
 0xad2   :  { %3855 = shalt.err (!%p3852_p7)
}
 0xad3   :  { %2696 = dma.vmem_to_hbm [thread:$0]  %s2694_s12, 128, %s5631_s6, [#allocation8]  }
 0xad4   :  { %3862 = dma.done.wait [#allocation8], 128  }
 0xad5   :  { %3863 = vsyncadd [#allocation8], 4294967168 }
 0xad6   :  { %2700 = vsyncpa [#allocation8], 1 }
 0xad7   :  { %2701 = vsyncmov [#allocation6] }
 0xada   :  { %s2702_s20 = vpop.sfrf %2701 }
 0xadb   :  { %p2851_p8 = scmp.ne.s32.totalorder %s2702_s20, 0 }
 0xadd   :  { %2706 = shalt.err (%p2851_p8)  }
 0xade   :  { %2708 = vsyncmov [#allocation6 + $0x1] }
 0xae1   :  { %s2709_s21 = vpop.sfrf %2708 }
 0xae2   :  { %p2852_p9 = scmp.ne.s32.totalorder %s2709_s21, 0 }
 0xae4   :  { %2713 = shalt.err (%p2852_p9)  }
 0xae5   :  { %2715 = vsyncmov [#allocation6 + $0x2] }
 0xae8   :  { %s2716_s2 = vpop.sfrf %2715 }
 0xae9   :  { %p2853_p10 = scmp.ne.s32.totalorder %s2716_s2, 0 }
 0xaeb   :  { %2720 = shalt.err (%p2853_p10)  }

</bundles_post_ra>
